<compile_context>
chip_gen: v5e
topology: v5e:2x2
jax: 0.10.0
libtpu: 0.0.40
codegen_flags: <defaults>
</compile_context>

<pallas_src>
import jax
import jax.numpy as jnp
import numpy as np
from jax.experimental import pallas as pl
from jax.experimental.pallas import tpu as pltpu

CHANNELS = 16        # "channels" in the module
BLOCKS = 5           # residual blocks
OUT_C = 4            # out_c
H = W = 4            # out_size = out_c * 16  =>  H * W = 16
IN_C = 16            # Conv2d(16, channels, 3, padding=1)
EPS = 1e-5

IN_FLAT = H * W * IN_C        # 256
FLAT = H * W * CHANNELS       # 256
OUT_FLAT = H * W * OUT_C      # 64
POLICY_OUT = 4


# ------------------------------ fused kernel -------------------------------- #

def convnet_kernel(x_ref, win_ref, bin_ref, w3_ref, b3_ref,
                   ow_ref, ob_ref, wp_ref, bp_ref, o_ref):
    """Whole ConvNet forward for one batch tile; activations stay in vregs/VMEM."""
    a = x_ref[...]                                              # (tile_n, 256)

    # in_block: Conv3x3 (+ folded BN scale) as one dense matmul -> bias -> ReLU
    a = jnp.maximum(
        jnp.dot(a, win_ref[...], preferred_element_type=jnp.float32)
        + bin_ref[...], 0.0)

    # residual blocks: a = relu(a + BN(Conv(relu(BN(Conv(a))))))
    for blk in range(BLOCKS):
        l1, l2 = 2 * blk, 2 * blk + 1
        h = jnp.maximum(
            jnp.dot(a, w3_ref[l1], preferred_element_type=jnp.float32)
            + b3_ref[l1:l1 + 1, :], 0.0)
        h = (jnp.dot(h, w3_ref[l2], preferred_element_type=jnp.float32)
             + b3_ref[l2:l2 + 1, :])
        a = jnp.maximum(a + h, 0.0)

    # out_block: 1x1 conv + BN (block-diagonal matrix, scale folded) -> ReLU
    y = jnp.maximum(
        jnp.dot(a, ow_ref[...], preferred_element_type=jnp.float32)
        + ob_ref[...], 0.0)                                     # (tile_n, 64)

    # policy Linear (flatten permutation folded into wp) + LogSoftmax(dim=1)
    logits = (jnp.dot(y, wp_ref[...], preferred_element_type=jnp.float32)
              + bp_ref[...])                                    # (tile_n, 4)
    m = jnp.max(logits, axis=1, keepdims=True)
    z = logits - m
    lse = jnp.log(jnp.sum(jnp.exp(z), axis=1, keepdims=True))
    # 4-wide store is masked, but negligible at these sizes.
    o_ref[...] = z - lse


# -------------------------------- wrapper ------------------------------------ #

def _round_up(v, m):
    return (v + m - 1) // m * m


def convnet_forward(x_nchw, p):
    n = x_nchw.shape[0]
    # NCHW -> NHWC -> spatial-major flat (N, H*W*IN_C)
    x2d = (jnp.transpose(x_nchw, (0, 2, 3, 1))
           .astype(jnp.float32)
           .reshape(n, IN_FLAT))

    tile_n = min(128, _round_up(n, 8))          # batch tile, multiple of 8 rows
    padded_n = _round_up(n, tile_n)
    if padded_n != n:
        x2d = jnp.pad(x2d, ((0, padded_n - n), (0, 0)))

    grid = (padded_n // tile_n,)
    in_specs = [
        pl.BlockSpec((tile_n, IN_FLAT), lambda i: (i, 0)),          # x tile
        pl.BlockSpec((IN_FLAT, FLAT), lambda i: (0, 0)),            # w_in (resident)
        pl.BlockSpec((1, FLAT), lambda i: (0, 0)),                  # b_in
        pl.BlockSpec((2 * BLOCKS, FLAT, FLAT), lambda i: (0, 0, 0)),  # w3 stack
        pl.BlockSpec((2 * BLOCKS, FLAT), lambda i: (0, 0)),         # b3 stack
        pl.BlockSpec((FLAT, OUT_FLAT), lambda i: (0, 0)),           # out_w
        pl.BlockSpec((1, OUT_FLAT), lambda i: (0, 0)),              # out_b
        pl.BlockSpec((OUT_FLAT, POLICY_OUT), lambda i: (0, 0)),     # wp
        pl.BlockSpec((1, POLICY_OUT), lambda i: (0, 0)),            # bp
    ]
    out_specs = pl.BlockSpec((tile_n, POLICY_OUT), lambda i: (i, 0))

    out = pl.pallas_call(
        convnet_kernel,
        out_shape=jax.ShapeDtypeStruct((padded_n, POLICY_OUT), jnp.float32),
        grid_spec=pltpu.PrefetchScalarGridSpec(
            num_scalar_prefetch=0, grid=grid,
            in_specs=in_specs, out_specs=out_specs),
        compiler_params=pltpu.CompilerParams(
            dimension_semantics=("parallel",)),   # v7x: shard batch tiles over 2 TCs
    )(x2d, p["w_in"], p["b_in"], p["w3"], p["b3"],
      p["out_w"], p["out_b"], p["wp"], p["bp"])
    return out[:n]


# --------------------------- parameters (glue) -------------------------------- #

def _fold_bn(gamma, beta, mean, var):
    scale = gamma / np.sqrt(var + EPS)
    shift = beta - mean * scale
    return scale, shift


def _conv3x3_matrix(w, scale):
    """PyTorch (Cout, Cin, 3, 3) conv weight (+ folded BN scale) -> dense
    (H*W*Cin, H*W*Cout) matrix acting on spatial-major NHWC-flat activations,
    with the padding=1 zero border baked in."""
    cout, cin = w.shape[0], w.shape[1]
    m = np.zeros((H * W * cin, H * W * cout), np.float32)
    ws = w * scale[:, None, None, None]                 # fold BN scale into Cout
    for ho in range(H):
        for wo in range(W):
            for ky in range(3):
                for kx in range(3):
                    hi, wi = ho + ky - 1, wo + kx - 1
                    if 0 <= hi < H and 0 <= wi < W:
                        r = (hi * W + wi) * cin
                        c = (ho * W + wo) * cout
                        m[r:r + cin, c:c + cout] = ws[:, :, ky, kx].T
    return m


def _conv1x1_matrix(w, scale):
    """PyTorch (Cout, Cin) 1x1 conv weight (+ folded BN scale) -> block-diagonal
    (H*W*Cin, H*W*Cout) matrix on the spatial-major flat layout."""
    cout, cin = w.shape
    m = np.zeros((H * W * cin, H * W * cout), np.float32)
    ws = (w * scale[:, None]).T                         # (cin, cout)
    for hw in range(H * W):
        m[hw * cin:(hw + 1) * cin, hw * cout:(hw + 1) * cout] = ws
    return m


def init_params(key):
    keys = iter(jax.random.split(key, 64))

    def normal(shape, s=0.1):
        return np.asarray(s * jax.random.normal(next(keys), shape, jnp.float32))

    def bn(c):
        gamma = 1.0 + normal((c,))
        beta = normal((c,))
        mean = normal((c,))
        var = np.abs(np.asarray(
            jax.random.normal(next(keys), (c,), jnp.float32))) + 0.5
        return _fold_bn(gamma, beta, mean, var)

    # in_block: Conv2d(16, channels, 3, padding=1, bias=False) + BN
    w_in = normal((CHANNELS, IN_C, 3, 3))
    s, b = bn(CHANNELS)
    p = {
        "w_in": jnp.asarray(_conv3x3_matrix(w_in, s)),           # (256, 256)
        "b_in": jnp.asarray(np.tile(b, H * W)[None, :]),         # (1, 256)
    }

    # residual blocks: 2 x (Conv3x3 + BN) each
    w3, b3 = [], []
    for _ in range(2 * BLOCKS):
        wl = normal((CHANNELS, CHANNELS, 3, 3))
        s, b = bn(CHANNELS)
        w3.append(_conv3x3_matrix(wl, s))
        b3.append(np.tile(b, H * W))
    p["w3"] = jnp.asarray(np.stack(w3))                          # (10, 256, 256)
    p["b3"] = jnp.asarray(np.stack(b3))                          # (10, 256)

    # out_block: Conv2d(channels, out_c, 1, bias=False) + BN
    w_out = normal((OUT_C, CHANNELS))
    s, b = bn(OUT_C)
    p["out_w"] = jnp.asarray(_conv1x1_matrix(w_out, s))          # (256, 64)
    p["out_b"] = jnp.asarray(np.tile(b, H * W)[None, :])         # (1, 64)

    # policy: nn.Linear(64, 4).  PyTorch flattens NCHW channel-major; permute
    # rows so our spatial-major flat layout reproduces the exact math.
    wp = normal((POLICY_OUT, OUT_C * H * W))                     # (4, 64)
    bp = normal((POLICY_OUT,))
    wpT = wp.T                                                   # rows = c*16 + hw
    p["wp"] = jnp.asarray(
        wpT.reshape(OUT_C, H * W, POLICY_OUT)
           .transpose(1, 0, 2)
           .reshape(H * W * OUT_C, POLICY_OUT))                  # rows = hw*OUT_C + c
    p["bp"] = jnp.asarray(bp[None, :])                           # (1, 4)
    return p


# ---------------------------------- main -------------------------------------- #

if __name__ == "__main__":
    key = jax.random.PRNGKey(0)
    kx, kp = jax.random.split(key)

    # input matches nn.Conv2d(16, channels, 3): NCHW = (batch, 16, 4, 4)
    x = jax.random.normal(kx, (2, IN_C, H, W), jnp.float32)
    params = init_params(kp)

    out = jax.jit(convnet_forward)(x, params)
    out = jax.block_until_ready(out)

    assert out.shape == (2, 4)
    assert out.dtype == jnp.float32
    # log-softmax rows must exponentiate-sum to 1
    assert jnp.allclose(jnp.sum(jnp.exp(out), axis=1), 1.0, atol=1e-4)
    print("KERNEL_OK")
</pallas_src>

<mosaic_0001>
module attributes {stable_mosaic.version = 11 : i64} {
  func.func @convnet_kernel(%arg0: i32, %arg1: memref<8x256xf32, #tpu.memory_space<vmem>>, %arg2: memref<256x256xf32, #tpu.memory_space<vmem>>, %arg3: memref<1x256xf32, #tpu.memory_space<vmem>>, %arg4: memref<10x256x256xf32, #tpu.memory_space<vmem>>, %arg5: memref<10x256xf32, #tpu.memory_space<vmem>>, %arg6: memref<256x64xf32, #tpu.memory_space<vmem>>, %arg7: memref<1x64xf32, #tpu.memory_space<vmem>>, %arg8: memref<64x4xf32, #tpu.memory_space<vmem>>, %arg9: memref<1x4xf32, #tpu.memory_space<vmem>>, %arg10: memref<8x4xf32, #tpu.memory_space<vmem>>) attributes {dimension_semantics = [#tpu.dimension_semantics<parallel>], iteration_bounds = array<i64: 1>, scalar_prefetch = 0 : i64, scratch_operands = 0 : i64, tpu.core_type = #tpu.core_type<tc>, window_params = [{transform_indices = @transform_0, window_bounds = array<i64: 8, 256>}, {pipeline_mode = #tpu.pipeline_mode<synchronous>, transform_indices = @transform_1, window_bounds = array<i64: 256, 256>}, {pipeline_mode = #tpu.pipeline_mode<synchronous>, transform_indices = @transform_2, window_bounds = array<i64: 1, 256>}, {pipeline_mode = #tpu.pipeline_mode<synchronous>, transform_indices = @transform_3, window_bounds = array<i64: 10, 256, 256>}, {pipeline_mode = #tpu.pipeline_mode<synchronous>, transform_indices = @transform_4, window_bounds = array<i64: 10, 256>}, {pipeline_mode = #tpu.pipeline_mode<synchronous>, transform_indices = @transform_5, window_bounds = array<i64: 256, 64>}, {pipeline_mode = #tpu.pipeline_mode<synchronous>, transform_indices = @transform_6, window_bounds = array<i64: 1, 64>}, {pipeline_mode = #tpu.pipeline_mode<synchronous>, transform_indices = @transform_7, window_bounds = array<i64: 64, 4>}, {pipeline_mode = #tpu.pipeline_mode<synchronous>, transform_indices = @transform_8, window_bounds = array<i64: 1, 4>}, {transform_indices = @transform_9, window_bounds = array<i64: 8, 4>}]} {
    %c0 = arith.constant 0 : index
    %c0_0 = arith.constant 0 : index
    %0 = vector.load %arg1[%c0, %c0_0] : memref<8x256xf32, #tpu.memory_space<vmem>>, vector<8x256xf32>
    %c0_1 = arith.constant 0 : index
    %c0_2 = arith.constant 0 : index
    %1 = vector.load %arg2[%c0_1, %c0_2] : memref<256x256xf32, #tpu.memory_space<vmem>>, vector<256x256xf32>
    %cst = arith.constant dense<0.000000e+00> : vector<8x256xf32>
    %2 = tpu.matmul %0, %1, %cst {dimension_numbers = #tpu.dot_dimension_numbers<[1], [0], [0], [1], [0, 0, 1, 1], [], []>} : vector<8x256xf32>, vector<256x256xf32>, vector<8x256xf32> -> vector<8x256xf32>
    %c0_3 = arith.constant 0 : index
    %c0_4 = arith.constant 0 : index
    %3 = vector.load %arg3[%c0_3, %c0_4] : memref<1x256xf32, #tpu.memory_space<vmem>>, vector<1x256xf32>
    %4 = vector.broadcast %3 : vector<1x256xf32> to vector<8x256xf32>
    %5 = arith.addf %2, %4 : vector<8x256xf32>
    %cst_5 = arith.constant 0.000000e+00 : f32
    %6 = vector.broadcast %cst_5 : f32 to vector<8x256xf32>
    %7 = arith.maximumf %5, %6 : vector<8x256xf32>
    %c0_6 = arith.constant 0 : index
    %c0_7 = arith.constant 0 : index
    %c0_8 = arith.constant 0 : index
    %8 = vector.load %arg4[%c0_6, %c0_7, %c0_8] : memref<10x256x256xf32, #tpu.memory_space<vmem>>, vector<1x256x256xf32>
    %9 = vector.shape_cast %8 : vector<1x256x256xf32> to vector<256x256xf32>
    %cst_9 = arith.constant dense<0.000000e+00> : vector<8x256xf32>
    %10 = tpu.matmul %7, %9, %cst_9 {dimension_numbers = #tpu.dot_dimension_numbers<[1], [0], [0], [1], [0, 0, 1, 1], [], []>} : vector<8x256xf32>, vector<256x256xf32>, vector<8x256xf32> -> vector<8x256xf32>
    %c0_10 = arith.constant 0 : index
    %c0_11 = arith.constant 0 : index
    %11 = vector.load %arg5[%c0_10, %c0_11] : memref<10x256xf32, #tpu.memory_space<vmem>>, vector<1x256xf32>
    %12 = vector.broadcast %11 : vector<1x256xf32> to vector<8x256xf32>
    %13 = arith.addf %10, %12 : vector<8x256xf32>
    %cst_12 = arith.constant 0.000000e+00 : f32
    %14 = vector.broadcast %cst_12 : f32 to vector<8x256xf32>
    %15 = arith.maximumf %13, %14 : vector<8x256xf32>
    %c1 = arith.constant 1 : index
    %c0_13 = arith.constant 0 : index
    %c0_14 = arith.constant 0 : index
    %16 = vector.load %arg4[%c1, %c0_13, %c0_14] : memref<10x256x256xf32, #tpu.memory_space<vmem>>, vector<1x256x256xf32>
    %17 = vector.shape_cast %16 : vector<1x256x256xf32> to vector<256x256xf32>
    %cst_15 = arith.constant dense<0.000000e+00> : vector<8x256xf32>
    %18 = tpu.matmul %15, %17, %cst_15 {dimension_numbers = #tpu.dot_dimension_numbers<[1], [0], [0], [1], [0, 0, 1, 1], [], []>} : vector<8x256xf32>, vector<256x256xf32>, vector<8x256xf32> -> vector<8x256xf32>
    %c1_16 = arith.constant 1 : index
    %c0_17 = arith.constant 0 : index
    %19 = vector.load %arg5[%c1_16, %c0_17] : memref<10x256xf32, #tpu.memory_space<vmem>>, vector<1x256xf32>
    %20 = vector.broadcast %19 : vector<1x256xf32> to vector<8x256xf32>
    %21 = arith.addf %18, %20 : vector<8x256xf32>
    %22 = arith.addf %7, %21 : vector<8x256xf32>
    %cst_18 = arith.constant 0.000000e+00 : f32
    %23 = vector.broadcast %cst_18 : f32 to vector<8x256xf32>
    %24 = arith.maximumf %22, %23 : vector<8x256xf32>
    %c2 = arith.constant 2 : index
    %c0_19 = arith.constant 0 : index
    %c0_20 = arith.constant 0 : index
    %25 = vector.load %arg4[%c2, %c0_19, %c0_20] : memref<10x256x256xf32, #tpu.memory_space<vmem>>, vector<1x256x256xf32>
    %26 = vector.shape_cast %25 : vector<1x256x256xf32> to vector<256x256xf32>
    %cst_21 = arith.constant dense<0.000000e+00> : vector<8x256xf32>
    %27 = tpu.matmul %24, %26, %cst_21 {dimension_numbers = #tpu.dot_dimension_numbers<[1], [0], [0], [1], [0, 0, 1, 1], [], []>} : vector<8x256xf32>, vector<256x256xf32>, vector<8x256xf32> -> vector<8x256xf32>
    %c2_22 = arith.constant 2 : index
    %c0_23 = arith.constant 0 : index
    %28 = vector.load %arg5[%c2_22, %c0_23] : memref<10x256xf32, #tpu.memory_space<vmem>>, vector<1x256xf32>
    %29 = vector.broadcast %28 : vector<1x256xf32> to vector<8x256xf32>
    %30 = arith.addf %27, %29 : vector<8x256xf32>
    %cst_24 = arith.constant 0.000000e+00 : f32
    %31 = vector.broadcast %cst_24 : f32 to vector<8x256xf32>
    %32 = arith.maximumf %30, %31 : vector<8x256xf32>
    %c3 = arith.constant 3 : index
    %c0_25 = arith.constant 0 : index
    %c0_26 = arith.constant 0 : index
    %33 = vector.load %arg4[%c3, %c0_25, %c0_26] : memref<10x256x256xf32, #tpu.memory_space<vmem>>, vector<1x256x256xf32>
    %34 = vector.shape_cast %33 : vector<1x256x256xf32> to vector<256x256xf32>
    %cst_27 = arith.constant dense<0.000000e+00> : vector<8x256xf32>
    %35 = tpu.matmul %32, %34, %cst_27 {dimension_numbers = #tpu.dot_dimension_numbers<[1], [0], [0], [1], [0, 0, 1, 1], [], []>} : vector<8x256xf32>, vector<256x256xf32>, vector<8x256xf32> -> vector<8x256xf32>
    %c3_28 = arith.constant 3 : index
    %c0_29 = arith.constant 0 : index
    %36 = vector.load %arg5[%c3_28, %c0_29] : memref<10x256xf32, #tpu.memory_space<vmem>>, vector<1x256xf32>
    %37 = vector.broadcast %36 : vector<1x256xf32> to vector<8x256xf32>
    %38 = arith.addf %35, %37 : vector<8x256xf32>
    %39 = arith.addf %24, %38 : vector<8x256xf32>
    %cst_30 = arith.constant 0.000000e+00 : f32
    %40 = vector.broadcast %cst_30 : f32 to vector<8x256xf32>
    %41 = arith.maximumf %39, %40 : vector<8x256xf32>
    %c4 = arith.constant 4 : index
    %c0_31 = arith.constant 0 : index
    %c0_32 = arith.constant 0 : index
    %42 = vector.load %arg4[%c4, %c0_31, %c0_32] : memref<10x256x256xf32, #tpu.memory_space<vmem>>, vector<1x256x256xf32>
    %43 = vector.shape_cast %42 : vector<1x256x256xf32> to vector<256x256xf32>
    %cst_33 = arith.constant dense<0.000000e+00> : vector<8x256xf32>
    %44 = tpu.matmul %41, %43, %cst_33 {dimension_numbers = #tpu.dot_dimension_numbers<[1], [0], [0], [1], [0, 0, 1, 1], [], []>} : vector<8x256xf32>, vector<256x256xf32>, vector<8x256xf32> -> vector<8x256xf32>
    %c4_34 = arith.constant 4 : index
    %c0_35 = arith.constant 0 : index
    %45 = vector.load %arg5[%c4_34, %c0_35] : memref<10x256xf32, #tpu.memory_space<vmem>>, vector<1x256xf32>
    %46 = vector.broadcast %45 : vector<1x256xf32> to vector<8x256xf32>
    %47 = arith.addf %44, %46 : vector<8x256xf32>
    %cst_36 = arith.constant 0.000000e+00 : f32
    %48 = vector.broadcast %cst_36 : f32 to vector<8x256xf32>
    %49 = arith.maximumf %47, %48 : vector<8x256xf32>
    %c5 = arith.constant 5 : index
    %c0_37 = arith.constant 0 : index
    %c0_38 = arith.constant 0 : index
    %50 = vector.load %arg4[%c5, %c0_37, %c0_38] : memref<10x256x256xf32, #tpu.memory_space<vmem>>, vector<1x256x256xf32>
    %51 = vector.shape_cast %50 : vector<1x256x256xf32> to vector<256x256xf32>
    %cst_39 = arith.constant dense<0.000000e+00> : vector<8x256xf32>
    %52 = tpu.matmul %49, %51, %cst_39 {dimension_numbers = #tpu.dot_dimension_numbers<[1], [0], [0], [1], [0, 0, 1, 1], [], []>} : vector<8x256xf32>, vector<256x256xf32>, vector<8x256xf32> -> vector<8x256xf32>
    %c5_40 = arith.constant 5 : index
    %c0_41 = arith.constant 0 : index
    %53 = vector.load %arg5[%c5_40, %c0_41] : memref<10x256xf32, #tpu.memory_space<vmem>>, vector<1x256xf32>
    %54 = vector.broadcast %53 : vector<1x256xf32> to vector<8x256xf32>
    %55 = arith.addf %52, %54 : vector<8x256xf32>
    %56 = arith.addf %41, %55 : vector<8x256xf32>
    %cst_42 = arith.constant 0.000000e+00 : f32
    %57 = vector.broadcast %cst_42 : f32 to vector<8x256xf32>
    %58 = arith.maximumf %56, %57 : vector<8x256xf32>
    %c6 = arith.constant 6 : index
    %c0_43 = arith.constant 0 : index
    %c0_44 = arith.constant 0 : index
    %59 = vector.load %arg4[%c6, %c0_43, %c0_44] : memref<10x256x256xf32, #tpu.memory_space<vmem>>, vector<1x256x256xf32>
    %60 = vector.shape_cast %59 : vector<1x256x256xf32> to vector<256x256xf32>
    %cst_45 = arith.constant dense<0.000000e+00> : vector<8x256xf32>
    %61 = tpu.matmul %58, %60, %cst_45 {dimension_numbers = #tpu.dot_dimension_numbers<[1], [0], [0], [1], [0, 0, 1, 1], [], []>} : vector<8x256xf32>, vector<256x256xf32>, vector<8x256xf32> -> vector<8x256xf32>
    %c6_46 = arith.constant 6 : index
    %c0_47 = arith.constant 0 : index
    %62 = vector.load %arg5[%c6_46, %c0_47] : memref<10x256xf32, #tpu.memory_space<vmem>>, vector<1x256xf32>
    %63 = vector.broadcast %62 : vector<1x256xf32> to vector<8x256xf32>
    %64 = arith.addf %61, %63 : vector<8x256xf32>
    %cst_48 = arith.constant 0.000000e+00 : f32
    %65 = vector.broadcast %cst_48 : f32 to vector<8x256xf32>
    %66 = arith.maximumf %64, %65 : vector<8x256xf32>
    %c7 = arith.constant 7 : index
    %c0_49 = arith.constant 0 : index
    %c0_50 = arith.constant 0 : index
    %67 = vector.load %arg4[%c7, %c0_49, %c0_50] : memref<10x256x256xf32, #tpu.memory_space<vmem>>, vector<1x256x256xf32>
    %68 = vector.shape_cast %67 : vector<1x256x256xf32> to vector<256x256xf32>
    %cst_51 = arith.constant dense<0.000000e+00> : vector<8x256xf32>
    %69 = tpu.matmul %66, %68, %cst_51 {dimension_numbers = #tpu.dot_dimension_numbers<[1], [0], [0], [1], [0, 0, 1, 1], [], []>} : vector<8x256xf32>, vector<256x256xf32>, vector<8x256xf32> -> vector<8x256xf32>
    %c7_52 = arith.constant 7 : index
    %c0_53 = arith.constant 0 : index
    %70 = vector.load %arg5[%c7_52, %c0_53] : memref<10x256xf32, #tpu.memory_space<vmem>>, vector<1x256xf32>
    %71 = vector.broadcast %70 : vector<1x256xf32> to vector<8x256xf32>
    %72 = arith.addf %69, %71 : vector<8x256xf32>
    %73 = arith.addf %58, %72 : vector<8x256xf32>
    %cst_54 = arith.constant 0.000000e+00 : f32
    %74 = vector.broadcast %cst_54 : f32 to vector<8x256xf32>
    %75 = arith.maximumf %73, %74 : vector<8x256xf32>
    %c8 = arith.constant 8 : index
    %c0_55 = arith.constant 0 : index
    %c0_56 = arith.constant 0 : index
    %76 = vector.load %arg4[%c8, %c0_55, %c0_56] : memref<10x256x256xf32, #tpu.memory_space<vmem>>, vector<1x256x256xf32>
    %77 = vector.shape_cast %76 : vector<1x256x256xf32> to vector<256x256xf32>
    %cst_57 = arith.constant dense<0.000000e+00> : vector<8x256xf32>
    %78 = tpu.matmul %75, %77, %cst_57 {dimension_numbers = #tpu.dot_dimension_numbers<[1], [0], [0], [1], [0, 0, 1, 1], [], []>} : vector<8x256xf32>, vector<256x256xf32>, vector<8x256xf32> -> vector<8x256xf32>
    %c8_58 = arith.constant 8 : index
    %c0_59 = arith.constant 0 : index
    %79 = vector.load %arg5[%c8_58, %c0_59] : memref<10x256xf32, #tpu.memory_space<vmem>>, vector<1x256xf32>
    %80 = vector.broadcast %79 : vector<1x256xf32> to vector<8x256xf32>
    %81 = arith.addf %78, %80 : vector<8x256xf32>
    %cst_60 = arith.constant 0.000000e+00 : f32
    %82 = vector.broadcast %cst_60 : f32 to vector<8x256xf32>
    %83 = arith.maximumf %81, %82 : vector<8x256xf32>
    %c9 = arith.constant 9 : index
    %c0_61 = arith.constant 0 : index
    %c0_62 = arith.constant 0 : index
    %84 = vector.load %arg4[%c9, %c0_61, %c0_62] : memref<10x256x256xf32, #tpu.memory_space<vmem>>, vector<1x256x256xf32>
    %85 = vector.shape_cast %84 : vector<1x256x256xf32> to vector<256x256xf32>
    %cst_63 = arith.constant dense<0.000000e+00> : vector<8x256xf32>
    %86 = tpu.matmul %83, %85, %cst_63 {dimension_numbers = #tpu.dot_dimension_numbers<[1], [0], [0], [1], [0, 0, 1, 1], [], []>} : vector<8x256xf32>, vector<256x256xf32>, vector<8x256xf32> -> vector<8x256xf32>
    %c9_64 = arith.constant 9 : index
    %c0_65 = arith.constant 0 : index
    %87 = vector.load %arg5[%c9_64, %c0_65] : memref<10x256xf32, #tpu.memory_space<vmem>>, vector<1x256xf32>
    %88 = vector.broadcast %87 : vector<1x256xf32> to vector<8x256xf32>
    %89 = arith.addf %86, %88 : vector<8x256xf32>
    %90 = arith.addf %75, %89 : vector<8x256xf32>
    %cst_66 = arith.constant 0.000000e+00 : f32
    %91 = vector.broadcast %cst_66 : f32 to vector<8x256xf32>
    %92 = arith.maximumf %90, %91 : vector<8x256xf32>
    %c0_67 = arith.constant 0 : index
    %c0_68 = arith.constant 0 : index
    %93 = vector.load %arg6[%c0_67, %c0_68] : memref<256x64xf32, #tpu.memory_space<vmem>>, vector<256x64xf32>
    %cst_69 = arith.constant dense<0.000000e+00> : vector<8x64xf32>
    %94 = tpu.matmul %92, %93, %cst_69 {dimension_numbers = #tpu.dot_dimension_numbers<[1], [0], [0], [1], [0, 0, 1, 1], [], []>} : vector<8x256xf32>, vector<256x64xf32>, vector<8x64xf32> -> vector<8x64xf32>
    %c0_70 = arith.constant 0 : index
    %c0_71 = arith.constant 0 : index
    %95 = vector.load %arg7[%c0_70, %c0_71] : memref<1x64xf32, #tpu.memory_space<vmem>>, vector<1x64xf32>
    %96 = vector.broadcast %95 : vector<1x64xf32> to vector<8x64xf32>
    %97 = arith.addf %94, %96 : vector<8x64xf32>
    %cst_72 = arith.constant 0.000000e+00 : f32
    %98 = vector.broadcast %cst_72 : f32 to vector<8x64xf32>
    %99 = arith.maximumf %97, %98 : vector<8x64xf32>
    %c0_73 = arith.constant 0 : index
    %c0_74 = arith.constant 0 : index
    %100 = vector.load %arg8[%c0_73, %c0_74] : memref<64x4xf32, #tpu.memory_space<vmem>>, vector<64x4xf32>
    %cst_75 = arith.constant dense<0.000000e+00> : vector<8x4xf32>
    %101 = tpu.matmul %99, %100, %cst_75 {dimension_numbers = #tpu.dot_dimension_numbers<[1], [0], [0], [1], [0, 0, 1, 1], [], []>} : vector<8x64xf32>, vector<64x4xf32>, vector<8x4xf32> -> vector<8x4xf32>
    %c0_76 = arith.constant 0 : index
    %c0_77 = arith.constant 0 : index
    %102 = vector.load %arg9[%c0_76, %c0_77] : memref<1x4xf32, #tpu.memory_space<vmem>>, vector<1x4xf32>
    %103 = vector.broadcast %102 : vector<1x4xf32> to vector<8x4xf32>
    %104 = arith.addf %101, %103 : vector<8x4xf32>
    %cst_78 = arith.constant dense<0xFF800000> : vector<8xf32>
    %105 = vector.multi_reduction <maximumf>, %104, %cst_78 [1] : vector<8x4xf32> to vector<8xf32>
    %106 = vector.shape_cast %105 : vector<8xf32> to vector<8x1xf32>
    %107 = vector.broadcast %106 : vector<8x1xf32> to vector<8x4xf32>
    %108 = arith.subf %104, %107 : vector<8x4xf32>
    %109 = math.exp %108 : vector<8x4xf32>
    %cst_79 = arith.constant dense<0.000000e+00> : vector<8xf32>
    %110 = vector.multi_reduction <add>, %109, %cst_79 [1] : vector<8x4xf32> to vector<8xf32>
    %111 = vector.shape_cast %110 : vector<8xf32> to vector<8x1xf32>
    %112 = math.log %111 : vector<8x1xf32>
    %113 = vector.broadcast %112 : vector<8x1xf32> to vector<8x4xf32>
    %114 = arith.subf %108, %113 : vector<8x4xf32>
    %c0_80 = arith.constant 0 : index
    %c0_81 = arith.constant 0 : index
    %115 = vector.load %arg10[%c0_80, %c0_81] : memref<8x4xf32, #tpu.memory_space<vmem>>, vector<8x4xf32>
    tpu.vector_store %arg10[%c0_80, %c0_81], %114 {strides = array<i32>} : memref<8x4xf32, #tpu.memory_space<vmem>>, vector<8x4xf32>,
    return
  }
  func.func @transform_0(%arg0: i32) -> (i32, i32) {
    %c0_i32 = arith.constant 0 : i32
    %c0_i32_0 = arith.constant 0 : i32
    return %arg0, %c0_i32 : i32, i32
  }
  func.func @transform_1(%arg0: i32) -> (i32, i32) {
    %c0_i32 = arith.constant 0 : i32
    %c0_i32_0 = arith.constant 0 : i32
    %c0_i32_1 = arith.constant 0 : i32
    return %c0_i32, %c0_i32_0 : i32, i32
  }
  func.func @transform_2(%arg0: i32) -> (i32, i32) {
    %c0_i32 = arith.constant 0 : i32
    %c0_i32_0 = arith.constant 0 : i32
    %c0_i32_1 = arith.constant 0 : i32
    return %c0_i32, %c0_i32_0 : i32, i32
  }
  func.func @transform_3(%arg0: i32) -> (i32, i32, i32) {
    %c0_i32 = arith.constant 0 : i32
    %c0_i32_0 = arith.constant 0 : i32
    %c0_i32_1 = arith.constant 0 : i32
    %c0_i32_2 = arith.constant 0 : i32
    return %c0_i32, %c0_i32_0, %c0_i32_1 : i32, i32, i32
  }
  func.func @transform_4(%arg0: i32) -> (i32, i32) {
    %c0_i32 = arith.constant 0 : i32
    %c0_i32_0 = arith.constant 0 : i32
    %c0_i32_1 = arith.constant 0 : i32
    return %c0_i32, %c0_i32_0 : i32, i32
  }
  func.func @transform_5(%arg0: i32) -> (i32, i32) {
    %c0_i32 = arith.constant 0 : i32
    %c0_i32_0 = arith.constant 0 : i32
    %c0_i32_1 = arith.constant 0 : i32
    return %c0_i32, %c0_i32_0 : i32, i32
  }
  func.func @transform_6(%arg0: i32) -> (i32, i32) {
    %c0_i32 = arith.constant 0 : i32
    %c0_i32_0 = arith.constant 0 : i32
    %c0_i32_1 = arith.constant 0 : i32
    return %c0_i32, %c0_i32_0 : i32, i32
  }
  func.func @transform_7(%arg0: i32) -> (i32, i32) {
    %c0_i32 = arith.constant 0 : i32
    %c0_i32_0 = arith.constant 0 : i32
    %c0_i32_1 = arith.constant 0 : i32
    return %c0_i32, %c0_i32_0 : i32, i32
  }
  func.func @transform_8(%arg0: i32) -> (i32, i32) {
    %c0_i32 = arith.constant 0 : i32
    %c0_i32_0 = arith.constant 0 : i32
    %c0_i32_1 = arith.constant 0 : i32
    return %c0_i32, %c0_i32_0 : i32, i32
  }
  func.func @transform_9(%arg0: i32) -> (i32, i32) {
    %c0_i32 = arith.constant 0 : i32
    %c0_i32_0 = arith.constant 0 : i32
    return %arg0, %c0_i32 : i32, i32
  }
}

</mosaic_0001>

<bundles_post_ra>
// kernel: convnet_forward.1
= control target key start
LH: loop header
LB: loop body
LE: loop exit
PB: predicated region body
PF: predicated region fallthrough
CT: control target
= control target key end

     0   :  { %14 = vsyncpa [#allocation3], 0  ;;  %s2382_s0 = inlined_call_operand.vmem [shape: f32[8,256], index: 0, kind: input, shape index: {}]   ;;  %s2383_s1 = inlined_call_operand.hbm [shape: f32[256,256], index: 1, kind: input, shape index: {}]   ;;  %s2384_s2 = inlined_call_operand.hbm [shape: f32[1,256], index: 2, kind: input, shape index: {}]   ;;  %s2385_s3 = inlined_call_operand.hbm [shape: f32[10,256,256], index: 3, kind: input, shape index: {}]   ;;  %s2386_s4 = inlined_call_operand.hbm [shape: f32[10,256], index: 4, kind: input, shape index: {}]   ;;  %s2387_s5 = inlined_call_operand.vmem [shape: f32[256,64], index: 5, kind: input, shape index: {}]   ;;  %s2388_s6 = inlined_call_operand.hbm [shape: f32[1,64], index: 6, kind: input, shape index: {}]   ;;  %s2389_s7 = inlined_call_operand.vmem [shape: f32[64,4], index: 7, kind: input, shape index: {}]   ;;  %s2390_s8 = inlined_call_operand.hbm [shape: f32[1,4], index: 8, kind: input, shape index: {}]   ;;  %s2391_s9 = inlined_call_operand.vmem [shape: f32[8,4], index: 9, kind: output, shape index: {}]  }
   0x1   :  { %15 = vsyncpa [#allocation5], 0 }
   0x2   :  { %16 = vsyncpa [#allocation8], 0  ;;  %s38_s11 = sshll.u32 %s2384_s2, 4  ;;  %s39_s11 = int_to_ptr.hbm [resolvable:$true] %s38_s11 }
   0x3   :  { %17 = vsyncpa [#allocation11], 0  ;;  %s2124_s12 = smov [#allocation4]   ;;  %s61_s16 = sshll.u32 %s2386_s4, 4  ;;  %s62_s16 = int_to_ptr.hbm [resolvable:$true] %s61_s16 }
   0x4   :  { %s40_s13 = sshll.u32 %s2124_s12, 4  ;;  %s2125_s17 = smov [#allocation7]   ;;  %s41_s13 = int_to_ptr.vmem [resolvable:$true] %s40_s13 }
   0x5   :  { %43 = dma.hbm_to_vmem [thread:$0]  %s39_s11, 32, %s41_s13, [#allocation5]  }
   0x6   :  { %s63_s18 = sshll.u32 %s2125_s17, 4  ;;  %s24_s21 = sshll.u32 %s2383_s1, 4  ;;  %s64_s18 = int_to_ptr.vmem [resolvable:$true] %s63_s18  ;;  %s25_s21 = int_to_ptr.hbm [resolvable:$true] %s24_s21 }
   0x7   :  { %s2126_s2 = smov 256   ;;  %s2127_s22 = smov 16  }
   0x8   :  { %69 = dma.hbm_to_vmem [thread:$0]  %s62_s16, 512, %s64_s18, [#allocation8], %s2126_s2, %s2126_s2, %s2127_s22  }
   0x9   :  { %s48_s25 = sshll.u32 %s2385_s3, 4  ;;  %s2128_s26 = smov [#allocation2]   ;;  %s49_s25 = int_to_ptr.hbm [resolvable:$true] %s48_s25 }
   0xa   :  { %s26_s27 = sshll.u32 %s2128_s26, 4  ;;  %s2129_s4 = smov [#allocation6]   ;;  %s27_s27 = int_to_ptr.vmem [resolvable:$true] %s26_s27 }
   0xb   :  { %32 = dma.hbm_to_vmem [thread:$0]  %s25_s21, 8192, %s27_s27, [#allocation3], %s2126_s2, %s2126_s2, %s2127_s22  }
   0xc   :  { %s50_s28 = sshll.u32 %s2129_s4, 4  ;;  %s77_s1 = sshll.u32 %s2388_s6, 4  ;;  %s51_s28 = int_to_ptr.vmem [resolvable:$true] %s50_s28  ;;  %s78_s1 = int_to_ptr.hbm [resolvable:$true] %s77_s1 }
   0xd   :  { %56 = dma.hbm_to_vmem [thread:$0]  %s49_s25, 81920, %s51_s28, [#allocation5], %s2126_s2, %s2126_s2, %s2127_s22  }
   0xe   :  { %s90_s12 = sshll.u32 %s2390_s8, 4  ;;  %s2130_s13 = smov [#allocation9]   ;;  %s91_s12 = int_to_ptr.hbm [resolvable:$true] %s90_s12 }
   0xf   :  { %s79_s3 = sshll.u32 %s2130_s13, 4  ;;  %s2131_s14 = smov [#allocation10]   ;;  %s80_s3 = int_to_ptr.vmem [resolvable:$true] %s79_s3 }
  0x10   :  { %82 = dma.hbm_to_vmem [thread:$0]  %s78_s1, 16, %s80_s3, [#allocation8]  }
  0x11   :  { %s92_s15 = sshll.u32 %s2131_s14, 4  ;;  %s93_s15 = int_to_ptr.vmem [resolvable:$true] %s92_s15 }
  0x12   :  { %95 = dma.hbm_to_vmem [thread:$0]  %s91_s12, 16, %s93_s15, [#allocation11]  }
  0x13   :  { %2116 = dma.done.wait [#allocation3], 8192  }
  0x14   :  { %2117 = vsyncadd [#allocation3], 4294959104 }
  0x15   :  { %2118 = dma.done.wait [#allocation5], 81952  }
  0x16   :  { %2119 = vsyncadd [#allocation5], 4294885344 }
  0x17   :  { %2120 = dma.done.wait [#allocation8], 528  }
  0x18   :  { %2121 = vsyncadd [#allocation8], 4294966768 }
  0x19   :  { %2122 = dma.done.wait [#allocation11], 16  }
  0x1a   :  { %2123 = vsyncadd [#allocation11], 4294967280  ;;  %v153_v0 = vld [vmem:[#allocation2 + $0xf8] sm:$0xff]  ;;  %v151_v1 = vld [vmem:[#allocation2 + $0xe8] sm:$0xff]  ;;  %vm1911_vm0 = vcmask 523264   ;;  %vm1935_vm1 = vcmask 31744  }
  0x1b   :  { %v185_v2 = vld [vmem:[#allocation2 + $0x1f8] sm:$0xff]  ;;  %232 = vmatpush.msra.mxu2 %v153_v0  ;;  %v152_v3 = vld [vmem:[#allocation2 + $0xf0] sm:$0xff]  ;;  %v183_v4 = vld [vmem:[#allocation2 + $0x1e8] sm:$0xff] }
  0x1c   :  { %252 = vmatpush.msra.mxu3 %v185_v2  ;;  %192 = vmatpush.msra.mxu0 %v152_v3  ;;  %v149_v5 = vld [vmem:[#allocation2 + $0xd8] sm:$0xff]  ;;  %v150_v6 = vld [vmem:[#allocation2 + $0xe0] sm:$0xff]  ;;  %v184_v7 = vld [vmem:[#allocation2 + $0x1f0] sm:$0xff] }
  0x1d   :  { %233 = vmatpush.msra.mxu2 %v151_v1  ;;  %v181_v8 = vld [vmem:[#allocation2 + $0x1d8] sm:$0xff]  ;;  %v148_v9 = vld [vmem:[#allocation2 + $0xd0] sm:$0xff]  ;;  %v182_v10 = vld [vmem:[#allocation2 + $0x1e0] sm:$0xff]  ;;  %212 = vmatpush.msra.mxu1 %v184_v7 }
  0x1e   :  { %253 = vmatpush.msra.mxu3 %v183_v4  ;;  %193 = vmatpush.msra.mxu0 %v150_v6  ;;  %v147_v11 = vld [vmem:[#allocation2 + $0xc8] sm:$0xff]  ;;  %v146_v13 = vld [vmem:[#allocation2 + $0xc0] sm:$0xff]  ;;  %v180_v14 = vld [vmem:[#allocation2 + $0x1d0] sm:$0xff] }
  0x1f   :  { %v179_v12 = vld [vmem:[#allocation2 + $0x1c8] sm:$0xff]  ;;  %234 = vmatpush.msra.mxu2 %v149_v5  ;;  %213 = vmatpush.msra.mxu1 %v182_v10  ;;  %v145_v15 = vld [vmem:[#allocation2 + $0xb8] sm:$0xff]  ;;  %v144_v17 = vld [vmem:[#allocation2 + $0xb0] sm:$0xff] }
  0x20   :  { %254 = vmatpush.msra.mxu3 %v181_v8  ;;  %194 = vmatpush.msra.mxu0 %v148_v9  ;;  %v177_v16 = vld [vmem:[#allocation2 + $0x1b8] sm:$0xff]  ;;  %v178_v18 = vld [vmem:[#allocation2 + $0x1c0] sm:$0xff]  ;;  %v143_v19 = vld [vmem:[#allocation2 + $0xa8] sm:$0xff] }
  0x21   :  { %235 = vmatpush.msra.mxu2 %v147_v11  ;;  %214 = vmatpush.msra.mxu1 %v180_v14  ;;  %v175_v20 = vld [vmem:[#allocation2 + $0x1a8] sm:$0xff]  ;;  %v142_v21 = vld [vmem:[#allocation2 + $0xa0] sm:$0xff]  ;;  %v176_v22 = vld [vmem:[#allocation2 + $0x1b0] sm:$0xff] }
  0x22   :  { %255 = vmatpush.msra.mxu3 %v179_v12  ;;  %195 = vmatpush.msra.mxu0 %v146_v13  ;;  %v141_v23 = vld [vmem:[#allocation2 + $0x98] sm:$0xff]  ;;  %v140_v25 = vld [vmem:[#allocation2 + $0x90] sm:$0xff]  ;;  %v174_v26 = vld [vmem:[#allocation2 + $0x1a0] sm:$0xff] }
  0x23   :  { %236 = vmatpush.msra.mxu2 %v145_v15  ;;  %215 = vmatpush.msra.mxu1 %v178_v18  ;;  %v173_v24 = vld [vmem:[#allocation2 + $0x198] sm:$0xff]  ;;  %v139_v27 = vld [vmem:[#allocation2 + $0x88] sm:$0xff]  ;;  %v138_v29 = vld [vmem:[#allocation2 + $0x80] sm:$0xff] }
  0x24   :  { %256 = vmatpush.msra.mxu3 %v177_v16  ;;  %196 = vmatpush.msra.mxu0 %v144_v17  ;;  %v171_v28 = vld [vmem:[#allocation2 + $0x188] sm:$0xff]  ;;  %v172_v30 = vld [vmem:[#allocation2 + $0x190] sm:$0xff]  ;;  %v137_v31 = vld [vmem:[#allocation2 + $0x78] sm:$0xff] }
  0x25   :  { %237 = vmatpush.msra.mxu2 %v143_v19  ;;  %216 = vmatpush.msra.mxu1 %v176_v22  ;;  %v169_v32 = vld [vmem:[#allocation2 + $0x178] sm:$0xff]  ;;  %v136_v33 = vld [vmem:[#allocation2 + $0x70] sm:$0xff]  ;;  %v170_v34 = vld [vmem:[#allocation2 + $0x180] sm:$0xff] }
  0x26   :  { %257 = vmatpush.msra.mxu3 %v175_v20  ;;  %197 = vmatpush.msra.mxu0 %v142_v21  ;;  %v135_v35 = vld [vmem:[#allocation2 + $0x68] sm:$0xff]  ;;  %v134_v37 = vld [vmem:[#allocation2 + $0x60] sm:$0xff]  ;;  %v168_v38 = vld [vmem:[#allocation2 + $0x170] sm:$0xff] }
  0x27   :  { %238 = vmatpush.msra.mxu2 %v141_v23  ;;  %217 = vmatpush.msra.mxu1 %v174_v26  ;;  %v167_v36 = vld [vmem:[#allocation2 + $0x168] sm:$0xff]  ;;  %v133_v39 = vld [vmem:[#allocation2 + $0x58] sm:$0xff]  ;;  %v132_v41 = vld [vmem:[#allocation2 + $0x50] sm:$0xff] }
  0x28   :  { %258 = vmatpush.msra.mxu3 %v173_v24  ;;  %198 = vmatpush.msra.mxu0 %v140_v25  ;;  %v165_v40 = vld [vmem:[#allocation2 + $0x158] sm:$0xff]  ;;  %v166_v42 = vld [vmem:[#allocation2 + $0x160] sm:$0xff]  ;;  %v131_v43 = vld [vmem:[#allocation2 + $0x48] sm:$0xff] }
  0x29   :  { %239 = vmatpush.msra.mxu2 %v139_v27  ;;  %218 = vmatpush.msra.mxu1 %v172_v30  ;;  %v163_v44 = vld [vmem:[#allocation2 + $0x148] sm:$0xff]  ;;  %v130_v45 = vld [vmem:[#allocation2 + $0x40] sm:$0xff]  ;;  %v164_v46 = vld [vmem:[#allocation2 + $0x150] sm:$0xff] }
  0x2a   :  { %259 = vmatpush.msra.mxu3 %v171_v28  ;;  %199 = vmatpush.msra.mxu0 %v138_v29  ;;  %v129_v47 = vld [vmem:[#allocation2 + $0x38] sm:$0xff]  ;;  %v128_v49 = vld [vmem:[#allocation2 + $0x30] sm:$0xff]  ;;  %v162_v50 = vld [vmem:[#allocation2 + $0x140] sm:$0xff] }
  0x2b   :  { %240 = vmatpush.msra.mxu2 %v137_v31  ;;  %219 = vmatpush.msra.mxu1 %v170_v34  ;;  %v161_v48 = vld [vmem:[#allocation2 + $0x138] sm:$0xff]  ;;  %v127_v51 = vld [vmem:[#allocation2 + $0x28] sm:$0xff]  ;;  %v126_v53 = vld [vmem:[#allocation2 + $0x20] sm:$0xff] }
  0x2c   :  { %260 = vmatpush.msra.mxu3 %v169_v32  ;;  %200 = vmatpush.msra.mxu0 %v136_v33  ;;  %v159_v52 = vld [vmem:[#allocation2 + $0x128] sm:$0xff]  ;;  %v160_v54 = vld [vmem:[#allocation2 + $0x130] sm:$0xff]  ;;  %v125_v55 = vld [vmem:[#allocation2 + $0x18] sm:$0xff] }
  0x2d   :  { %241 = vmatpush.msra.mxu2 %v135_v35  ;;  %220 = vmatpush.msra.mxu1 %v168_v38  ;;  %v157_v56 = vld [vmem:[#allocation2 + $0x118] sm:$0xff]  ;;  %v124_v57 = vld [vmem:[#allocation2 + $0x10] sm:$0xff]  ;;  %v158_v58 = vld [vmem:[#allocation2 + $0x120] sm:$0xff] }
  0x2e   :  { %261 = vmatpush.msra.mxu3 %v167_v36  ;;  %201 = vmatpush.msra.mxu0 %v134_v37  ;;  %v123_v59 = vld [vmem:[#allocation2 + $0x8] sm:$0xff]  ;;  %v120_v61 = vld [vmem:[%s2382_s0] sm:$0xff]  ;;  %v156_v0 = vld [vmem:[#allocation2 + $0x110] sm:$0xff] }
  0x2f   :  { %242 = vmatpush.msra.mxu2 %v133_v39  ;;  %221 = vmatpush.msra.mxu1 %v166_v42  ;;  %v155_v60 = vld [vmem:[#allocation2 + $0x108] sm:$0xff]  ;;  %v122_v63 = vld [vmem:[#allocation2] sm:$0xff]  ;;  %v304_v3 = vld [vmem:[#allocation6 + $0xf0] sm:$0xff] }
  0x30   :  { %262 = vmatpush.msra.mxu3 %v165_v40  ;;  %202 = vmatpush.msra.mxu0 %v132_v41  ;;  %v121_v62 = vld [vmem:[%s2382_s0 + $0x8] sm:$0xff]  ;;  %v305_v1 = vld [vmem:[#allocation6 + $0xf8] sm:$0xff]  ;;  %v336_v6 = vld [vmem:[#allocation6 + $0x1f0] sm:$0xff] }
  0x31   :  { %243 = vmatpush.msra.mxu2 %v131_v43  ;;  %222 = vmatpush.msra.mxu1 %v164_v46  ;;  %v154_v2 = vld [vmem:[#allocation2 + $0x100] sm:$0xff]  ;;  %v303_v4 = vld [vmem:[#allocation6 + $0xe8] sm:$0xff]  ;;  %v300_v9 = vld [vmem:[#allocation6 + $0xd0] sm:$0xff] }
  0x32   :  { %263 = vmatpush.msra.mxu3 %v163_v44  ;;  %203 = vmatpush.msra.mxu0 %v130_v45  ;;  %v302_v5 = vld [vmem:[#allocation6 + $0xe0] sm:$0xff]  ;;  %v337_v7 = vld [vmem:[#allocation6 + $0x1f8] sm:$0xff]  ;;  %v335_v11 = vld [vmem:[#allocation6 + $0x1e8] sm:$0xff] }
  0x33   :  { %244 = vmatpush.msra.mxu2 %v129_v47  ;;  %223 = vmatpush.msra.mxu1 %v162_v50  ;;  %v301_v8 = vld [vmem:[#allocation6 + $0xd8] sm:$0xff]  ;;  %v334_v10 = vld [vmem:[#allocation6 + $0x1e0] sm:$0xff]  ;;  %v299_v12 = vld [vmem:[#allocation6 + $0xc8] sm:$0xff] }
  0x34   :  { %264 = vmatpush.msra.mxu3 %v161_v48  ;;  %204 = vmatpush.msra.mxu0 %v128_v49  ;;  %v298_v13 = vld [vmem:[#allocation6 + $0xc0] sm:$0xff]  ;;  %v332_v14 = vld [vmem:[#allocation6 + $0x1d0] sm:$0xff]  ;;  %v333_v15 = vld [vmem:[#allocation6 + $0x1d8] sm:$0xff] }
  0x35   :  { %245 = vmatpush.msra.mxu2 %v127_v51  ;;  %224 = vmatpush.msra.mxu1 %v160_v54  ;;  %v297_v16 = vld [vmem:[#allocation6 + $0xb8] sm:$0xff]  ;;  %v296_v17 = vld [vmem:[#allocation6 + $0xb0] sm:$0xff]  ;;  %v330_v18 = vld [vmem:[#allocation6 + $0x1c0] sm:$0xff] }
  0x36   :  { %265 = vmatpush.msra.mxu3 %v159_v52  ;;  %205 = vmatpush.msra.mxu0 %v126_v53  ;;  %v331_v19 = vld [vmem:[#allocation6 + $0x1c8] sm:$0xff]  ;;  %v294_v21 = vld [vmem:[#allocation6 + $0xa0] sm:$0xff]  ;;  %v328_v22 = vld [vmem:[#allocation6 + $0x1b0] sm:$0xff] }
  0x37   :  { %246 = vmatpush.msra.mxu2 %v125_v55  ;;  %225 = vmatpush.msra.mxu1 %v158_v58  ;;  %v295_v20 = vld [vmem:[#allocation6 + $0xa8] sm:$0xff]  ;;  %v329_v23 = vld [vmem:[#allocation6 + $0x1b8] sm:$0xff]  ;;  %v292_v25 = vld [vmem:[#allocation6 + $0x90] sm:$0xff] }
  0x38   :  { %266 = vmatpush.msra.mxu3 %v157_v56  ;;  %206 = vmatpush.msra.mxu0 %v124_v57  ;;  %v293_v24 = vld [vmem:[#allocation6 + $0x98] sm:$0xff]  ;;  %v326_v26 = vld [vmem:[#allocation6 + $0x1a0] sm:$0xff]  ;;  %v327_v27 = vld [vmem:[#allocation6 + $0x1a8] sm:$0xff] }
  0x39   :  { %247 = vmatpush.msra.mxu2 %v123_v59  ;;  %226 = vmatpush.msra.mxu1 %v156_v0  ;;  %v291_v28 = vld [vmem:[#allocation6 + $0x88] sm:$0xff]  ;;  %v290_v29 = vld [vmem:[#allocation6 + $0x80] sm:$0xff]  ;;  %v324_v30 = vld [vmem:[#allocation6 + $0x190] sm:$0xff] }
  0x3a   :  { %267 = vmatpush.msra.mxu3 %v155_v60  ;;  %248 = vmatmul.f32.vlgmr.msra.gmra.mxu2 %v120_v61  ;;  %v325_v31 = vld [vmem:[#allocation6 + $0x198] sm:$0xff]  ;;  %v288_v33 = vld [vmem:[#allocation6 + $0x70] sm:$0xff]  ;;  %v322_v34 = vld [vmem:[#allocation6 + $0x180] sm:$0xff] }
  0x3b   :  { %268 = vmatmul.f32.vlgmr.msra.gmra.mxu3 %v121_v62  ;;  %207 = vmatpush.msra.mxu0 %v122_v63  ;;  %v289_v32 = vld [vmem:[#allocation6 + $0x78] sm:$0xff]  ;;  %v323_v35 = vld [vmem:[#allocation6 + $0x188] sm:$0xff]  ;;  %v286_v37 = vld [vmem:[#allocation6 + $0x60] sm:$0xff] }
  0x3c   :  { %208 = vmatmul.f32.vlgmr.msra.gmra.mxu0 %v120_v61  ;;  %384 = vmatpush.msrb.mxu2 %v305_v1  ;;  %v287_v36 = vld [vmem:[#allocation6 + $0x68] sm:$0xff]  ;;  %v320_v38 = vld [vmem:[#allocation6 + $0x170] sm:$0xff]  ;;  %v321_v39 = vld [vmem:[#allocation6 + $0x178] sm:$0xff] }
  0x3d   :  { %227 = vmatpush.msra.mxu1 %v154_v2  ;;  %344 = vmatpush.msrb.mxu0 %v304_v3  ;;  %v285_v40 = vld [vmem:[#allocation6 + $0x58] sm:$0xff]  ;;  %v284_v41 = vld [vmem:[#allocation6 + $0x50] sm:$0xff]  ;;  %v318_v42 = vld [vmem:[#allocation6 + $0x160] sm:$0xff] }
  0x3e   :  { %228 = vmatmul.f32.vlgmr.msra.gmra.mxu1 %v121_v62  ;;  %385 = vmatpush.msrb.mxu2 %v303_v4  ;;  %v319_v43 = vld [vmem:[#allocation6 + $0x168] sm:$0xff]  ;;  %v282_v45 = vld [vmem:[#allocation6 + $0x40] sm:$0xff]  ;;  %v316_v46 = vld [vmem:[#allocation6 + $0x150] sm:$0xff] }
  0x3f   :  { %345 = vmatpush.msrb.mxu0 %v302_v5  ;;  %364 = vmatpush.msrb.mxu1 %v336_v6  ;;  %v283_v44 = vld [vmem:[#allocation6 + $0x48] sm:$0xff]  ;;  %v317_v47 = vld [vmem:[#allocation6 + $0x158] sm:$0xff]  ;;  %v280_v48 = vld [vmem:[#allocation6 + $0x30] sm:$0xff] }
  0x40   :  { %404 = vmatpush.msrb.mxu3 %v337_v7  ;;  %386 = vmatpush.msrb.mxu2 %v301_v8  ;;  %v314_v49 = vld [vmem:[#allocation6 + $0x140] sm:$0xff]  ;;  %v281_v50 = vld [vmem:[#allocation6 + $0x38] sm:$0xff]  ;;  %v315_v51 = vld [vmem:[#allocation6 + $0x148] sm:$0xff] }
  0x41   :  { %346 = vmatpush.msrb.mxu0 %v300_v9  ;;  %365 = vmatpush.msrb.mxu1 %v334_v10  ;;  %v278_v52 = vld [vmem:[#allocation6 + $0x20] sm:$0xff]  ;;  %v312_v53 = vld [vmem:[#allocation6 + $0x130] sm:$0xff]  ;;  %v279_v54 = vld [vmem:[#allocation6 + $0x28] sm:$0xff] }
  0x42   :  { %405 = vmatpush.msrb.mxu3 %v335_v11  ;;  %387 = vmatpush.msrb.mxu2 %v299_v12  ;;  %v313_v55 = vld [vmem:[#allocation6 + $0x138] sm:$0xff]  ;;  %v276_v56 = vld [vmem:[#allocation6 + $0x10] sm:$0xff]  ;;  %v310_v57 = vld [vmem:[#allocation6 + $0x120] sm:$0xff] }
  0x43   :  { %347 = vmatpush.msrb.mxu0 %v298_v13  ;;  %366 = vmatpush.msrb.mxu1 %v332_v14  ;;  %v277_v58 = vld [vmem:[#allocation6 + $0x18] sm:$0xff]  ;;  %v311_v59 = vld [vmem:[#allocation6 + $0x128] sm:$0xff]  ;;  %v274_v60 = vld [vmem:[#allocation6] sm:$0xff] }
  0x44   :  { %406 = vmatpush.msrb.mxu3 %v333_v15  ;;  %388 = vmatpush.msrb.mxu2 %v297_v16  ;;  %v308_v61 = vld [vmem:[#allocation6 + $0x110] sm:$0xff]  ;;  %v275_v62 = vld [vmem:[#allocation6 + $0x8] sm:$0xff]  ;;  %v309_v63 = vld [vmem:[#allocation6 + $0x118] sm:$0xff] }
  0x45   :  { %348 = vmatpush.msrb.mxu0 %v296_v17  ;;  %367 = vmatpush.msrb.mxu1 %v330_v18  ;;  %v306_v0 = vld [vmem:[#allocation6 + $0x100] sm:$0xff]  ;;  %v307_v1 = vld [vmem:[#allocation6 + $0x108] sm:$0xff]  ;;  %v457_v2 = vld [vmem:[#allocation6 + $0x2f0] sm:$0xff] }
  0x46   :  { %407 = vmatpush.msrb.mxu3 %v331_v19  ;;  %389 = vmatpush.msrb.mxu2 %v295_v20  ;;  %v458_v3 = vld [vmem:[#allocation6 + $0x2f8] sm:$0xff]  ;;  %v455_v4 = vld [vmem:[#allocation6 + $0x2e0] sm:$0xff]  ;;  %v456_v5 = vld [vmem:[#allocation6 + $0x2e8] sm:$0xff] }
  0x47   :  { %349 = vmatpush.msrb.mxu0 %v294_v21  ;;  %368 = vmatpush.msrb.mxu1 %v328_v22  ;;  %v453_v6 = vld [vmem:[#allocation6 + $0x2d0] sm:$0xff]  ;;  %v454_v7 = vld [vmem:[#allocation6 + $0x2d8] sm:$0xff]  ;;  %v487_v10 = vld [vmem:[#allocation6 + $0x3e0] sm:$0xff] }
  0x48   :  { %408 = vmatpush.msrb.mxu3 %v329_v23  ;;  %390 = vmatpush.msrb.mxu2 %v293_v24  ;;  %v489_v8 = vld [vmem:[#allocation6 + $0x3f0] sm:$0xff]  ;;  %v490_v9 = vld [vmem:[#allocation6 + $0x3f8] sm:$0xff]  ;;  %v451_v11 = vld [vmem:[#allocation6 + $0x2c0] sm:$0xff] }
  0x49   :  { %350 = vmatpush.msrb.mxu0 %v292_v25  ;;  %369 = vmatpush.msrb.mxu1 %v326_v26  ;;  %v452_v12 = vld [vmem:[#allocation6 + $0x2c8] sm:$0xff]  ;;  %v485_v14 = vld [vmem:[#allocation6 + $0x3d0] sm:$0xff]  ;;  %v486_v15 = vld [vmem:[#allocation6 + $0x3d8] sm:$0xff] }
  0x4a   :  { %409 = vmatpush.msrb.mxu3 %v327_v27  ;;  %391 = vmatpush.msrb.mxu2 %v291_v28  ;;  %v488_v13 = vld [vmem:[#allocation6 + $0x3e8] sm:$0xff]  ;;  %v449_v16 = vld [vmem:[#allocation6 + $0x2b0] sm:$0xff]  ;;  %v450_v17 = vld [vmem:[#allocation6 + $0x2b8] sm:$0xff] }
  0x4b   :  { %351 = vmatpush.msrb.mxu0 %v290_v29  ;;  %370 = vmatpush.msrb.mxu1 %v324_v30  ;;  %v483_v18 = vld [vmem:[#allocation6 + $0x3c0] sm:$0xff]  ;;  %v484_v19 = vld [vmem:[#allocation6 + $0x3c8] sm:$0xff]  ;;  %v481_v22 = vld [vmem:[#allocation6 + $0x3b0] sm:$0xff] }
  0x4c   :  { %410 = vmatpush.msrb.mxu3 %v325_v31  ;;  %392 = vmatpush.msrb.mxu2 %v289_v32  ;;  %v447_v20 = vld [vmem:[#allocation6 + $0x2a0] sm:$0xff]  ;;  %v448_v21 = vld [vmem:[#allocation6 + $0x2a8] sm:$0xff]  ;;  %v482_v23 = vld [vmem:[#allocation6 + $0x3b8] sm:$0xff] }
  0x4d   :  { %352 = vmatpush.msrb.mxu0 %v288_v33  ;;  %371 = vmatpush.msrb.mxu1 %v322_v34  ;;  %v445_v24 = vld [vmem:[#allocation6 + $0x290] sm:$0xff]  ;;  %v446_v25 = vld [vmem:[#allocation6 + $0x298] sm:$0xff]  ;;  %v479_v26 = vld [vmem:[#allocation6 + $0x3a0] sm:$0xff] }
  0x4e   :  { %411 = vmatpush.msrb.mxu3 %v323_v35  ;;  %393 = vmatpush.msrb.mxu2 %v287_v36  ;;  %v480_v27 = vld [vmem:[#allocation6 + $0x3a8] sm:$0xff]  ;;  %v443_v28 = vld [vmem:[#allocation6 + $0x280] sm:$0xff]  ;;  %v477_v30 = vld [vmem:[#allocation6 + $0x390] sm:$0xff] }
  0x4f   :  { %353 = vmatpush.msrb.mxu0 %v286_v37  ;;  %372 = vmatpush.msrb.mxu1 %v320_v38  ;;  %v444_v29 = vld [vmem:[#allocation6 + $0x288] sm:$0xff]  ;;  %v478_v31 = vld [vmem:[#allocation6 + $0x398] sm:$0xff]  ;;  %v441_v32 = vld [vmem:[#allocation6 + $0x270] sm:$0xff] }
  0x50   :  { %412 = vmatpush.msrb.mxu3 %v321_v39  ;;  %394 = vmatpush.msrb.mxu2 %v285_v40  ;;  %v442_v33 = vld [vmem:[#allocation6 + $0x278] sm:$0xff]  ;;  %v475_v35 = vld [vmem:[#allocation6 + $0x380] sm:$0xff]  ;;  %v476_v36 = vld [vmem:[#allocation6 + $0x388] sm:$0xff] }
  0x51   :  { %354 = vmatpush.msrb.mxu0 %v284_v41  ;;  %373 = vmatpush.msrb.mxu1 %v318_v42  ;;  %v186_v34 = vld [vmem:[#allocation4] sm:$0x3]  ;;  %v439_v37 = vld [vmem:[#allocation6 + $0x260] sm:$0xff]  ;;  %v440_v38 = vld [vmem:[#allocation6 + $0x268] sm:$0xff] }
  0x52   :  { %413 = vmatpush.msrb.mxu3 %v319_v43  ;;  %395 = vmatpush.msrb.mxu2 %v283_v44  ;;  %v473_v39 = vld [vmem:[#allocation6 + $0x370] sm:$0xff]  ;;  %v474_v40 = vld [vmem:[#allocation6 + $0x378] sm:$0xff]  ;;  %v188_v41 = vperm.slane %v186_v34, 0  ;;  %v435_v44 = vld [vmem:[#allocation6 + $0x240] sm:$0xff] }
  0x53   :  { %355 = vmatpush.msrb.mxu0 %v282_v45  ;;  %374 = vmatpush.msrb.mxu1 %v316_v46  ;;  %v437_v42 = vld [vmem:[#allocation6 + $0x250] sm:$0xff]  ;;  %v438_v43 = vld [vmem:[#allocation6 + $0x258] sm:$0xff]  ;;  %v436_v45 = vld [vmem:[#allocation6 + $0x248] sm:$0xff] }
  0x54   :  { %414 = vmatpush.msrb.mxu3 %v317_v47  ;;  %396 = vmatpush.msrb.mxu2 %v281_v50 }
  0x55   :  { %356 = vmatpush.msrb.mxu0 %v280_v48  ;;  %375 = vmatpush.msrb.mxu1 %v314_v49  ;;  %v189_v48 = vperm.slane %v186_v34, 1  ;;  %v604_v34 = vld [vmem:[#allocation6 + $0x4a8] sm:$0xff] }
  0x56   :  { %415 = vmatpush.msrb.mxu3 %v315_v51  ;;  %397 = vmatpush.msrb.mxu2 %v279_v54 }
  0x57   :  { %357 = vmatpush.msrb.mxu0 %v278_v52  ;;  %376 = vmatpush.msrb.mxu1 %v312_v53 }
  0x58   :  { %416 = vmatpush.msrb.mxu3 %v313_v55  ;;  %398 = vmatpush.msrb.mxu2 %v277_v58  ;;  %v471_v58 = vld [vmem:[#allocation6 + $0x360] sm:$0xff] }
  0x59   :  { %358 = vmatpush.msrb.mxu0 %v276_v56  ;;  %377 = vmatpush.msrb.mxu1 %v310_v57  ;;  %v433_v57 = vld [vmem:[#allocation6 + $0x230] sm:$0xff] }
  0x5a   :  { %417 = vmatpush.msrb.mxu3 %v311_v59  ;;  %399 = vmatpush.msrb.mxu2 %v275_v62  ;;  %v434_v59 = vld [vmem:[#allocation6 + $0x238] sm:$0xff]  ;;  %v469_v62 = vld [vmem:[#allocation6 + $0x350] sm:$0xff] }
  0x5b   :  { %359 = vmatpush.msrb.mxu0 %v274_v60  ;;  %378 = vmatpush.msrb.mxu1 %v308_v61  ;;  %v472_v60 = vld [vmem:[#allocation6 + $0x368] sm:$0xff]  ;;  %v431_v61 = vld [vmem:[#allocation6 + $0x220] sm:$0xff] }
  0x5c   :  { %418 = vmatpush.msrb.mxu3 %v309_v63  ;;  %538 = vmatpush.msra.mxu2 %v458_v3  ;;  %v432_v63 = vld [vmem:[#allocation6 + $0x228] sm:$0xff]  ;;  %v430_v3 = vld [vmem:[#allocation6 + $0x218] sm:$0xff] }
  0x5d   :  { %379 = vmatpush.msrb.mxu1 %v306_v0  ;;  %498 = vmatpush.msra.mxu0 %v457_v2  ;;  %v470_v0 = vld [vmem:[#allocation6 + $0x358] sm:$0xff]  ;;  %v467_v2 = vld [vmem:[#allocation6 + $0x340] sm:$0xff] }
  0x5e   :  { %419 = vmatpush.msrb.mxu3 %v307_v1  ;;  %539 = vmatpush.msra.mxu2 %v456_v5  ;;  %v429_v1 = vld [vmem:[#allocation6 + $0x210] sm:$0xff]  ;;  %v427_v5 = vld [vmem:[#allocation6 + $0x200] sm:$0xff] }
  0x5f   :  { %499 = vmatpush.msra.mxu0 %v455_v4  ;;  %518 = vmatpush.msra.mxu1 %v489_v8  ;;  %v468_v4 = vld [vmem:[#allocation6 + $0x348] sm:$0xff]  ;;  %v466_v8 = vld [vmem:[#allocation6 + $0x338] sm:$0xff] }
  0x60   :  { %558 = vmatpush.msra.mxu3 %v490_v9  ;;  %540 = vmatpush.msra.mxu2 %v454_v7  ;;  %v428_v7 = vld [vmem:[#allocation6 + $0x208] sm:$0xff]  ;;  %v463_v9 = vld [vmem:[#allocation6 + $0x320] sm:$0xff] }
  0x61   :  { %500 = vmatpush.msra.mxu0 %v453_v6  ;;  %519 = vmatpush.msra.mxu1 %v487_v10  ;;  %v465_v6 = vld [vmem:[#allocation6 + $0x330] sm:$0xff]  ;;  %v464_v10 = vld [vmem:[#allocation6 + $0x328] sm:$0xff] }
  0x62   :  { %559 = vmatpush.msra.mxu3 %v488_v13  ;;  %541 = vmatpush.msra.mxu2 %v452_v12  ;;  %v462_v12 = vld [vmem:[#allocation6 + $0x318] sm:$0xff]  ;;  %v459_v13 = vld [vmem:[#allocation6 + $0x300] sm:$0xff] }
  0x63   :  { %501 = vmatpush.msra.mxu0 %v451_v11  ;;  %520 = vmatpush.msra.mxu1 %v485_v14  ;;  %v461_v11 = vld [vmem:[#allocation6 + $0x310] sm:$0xff]  ;;  %v460_v14 = vld [vmem:[#allocation6 + $0x308] sm:$0xff] }
  0x64   :  { %560 = vmatpush.msra.mxu3 %v486_v15  ;;  %542 = vmatpush.msra.mxu2 %v450_v17  ;;  %v613_v15 = vld [vmem:[#allocation6 + $0x4f0] sm:$0xff]  ;;  %v611_v17 = vld [vmem:[#allocation6 + $0x4e0] sm:$0xff] }
  0x65   :  { %502 = vmatpush.msra.mxu0 %v449_v16  ;;  %521 = vmatpush.msra.mxu1 %v483_v18  ;;  %v614_v16 = vld [vmem:[#allocation6 + $0x4f8] sm:$0xff]  ;;  %v612_v18 = vld [vmem:[#allocation6 + $0x4e8] sm:$0xff] }
  0x66   :  { %561 = vmatpush.msra.mxu3 %v484_v19  ;;  %543 = vmatpush.msra.mxu2 %v448_v21  ;;  %v609_v19 = vld [vmem:[#allocation6 + $0x4d0] sm:$0xff] }
  0x67   :  { %503 = vmatpush.msra.mxu0 %v447_v20  ;;  %522 = vmatpush.msra.mxu1 %v481_v22  ;;  %v610_v20 = vld [vmem:[#allocation6 + $0x4d8] sm:$0xff]  ;;  %v645_v21 = vld [vmem:[#allocation6 + $0x5f0] sm:$0xff] }
  0x68   :  { %562 = vmatpush.msra.mxu3 %v482_v23  ;;  %544 = vmatpush.msra.mxu2 %v446_v25  ;;  %v646_v22 = vld [vmem:[#allocation6 + $0x5f8] sm:$0xff]  ;;  %v643_v23 = vld [vmem:[#allocation6 + $0x5e0] sm:$0xff]  ;;  %v608_v25 = vld [vmem:[#allocation6 + $0x4c8] sm:$0xff] }
  0x69   :  { %504 = vmatpush.msra.mxu0 %v445_v24  ;;  %523 = vmatpush.msra.mxu1 %v479_v26  ;;  %v607_v24 = vld [vmem:[#allocation6 + $0x4c0] sm:$0xff]  ;;  %v644_v26 = vld [vmem:[#allocation6 + $0x5e8] sm:$0xff] }
  0x6a   :  { %563 = vmatpush.msra.mxu3 %v480_v27  ;;  %545 = vmatpush.msra.mxu2 %v444_v29  ;;  %v641_v27 = vld [vmem:[#allocation6 + $0x5d0] sm:$0xff] }
  0x6b   :  { %505 = vmatpush.msra.mxu0 %v443_v28  ;;  %524 = vmatpush.msra.mxu1 %v477_v30  ;;  %v642_v28 = vld [vmem:[#allocation6 + $0x5d8] sm:$0xff]  ;;  %v605_v29 = vld [vmem:[#allocation6 + $0x4b0] sm:$0xff] }
  0x6c   :  { %564 = vmatpush.msra.mxu3 %v478_v31  ;;  %546 = vmatpush.msra.mxu2 %v442_v33  ;;  %v606_v30 = vld [vmem:[#allocation6 + $0x4b8] sm:$0xff]  ;;  %v639_v31 = vld [vmem:[#allocation6 + $0x5c0] sm:$0xff] }
  0x6d   :  { %506 = vmatpush.msra.mxu0 %v441_v32  ;;  %525 = vmatpush.msra.mxu1 %v475_v35  ;;  %v640_v32 = vld [vmem:[#allocation6 + $0x5c8] sm:$0xff]  ;;  %v603_v33 = vld [vmem:[#allocation6 + $0x4a0] sm:$0xff]  ;;  %v637_v35 = vld [vmem:[#allocation6 + $0x5b0] sm:$0xff] }
  0x6e   :  { %565 = vmatpush.msra.mxu3 %v476_v36  ;;  %547 = vmatpush.msra.mxu2 %v440_v38  ;;  %v638_v36 = vld [vmem:[#allocation6 + $0x5b8] sm:$0xff] }
  0x6f   :  { %507 = vmatpush.msra.mxu0 %v439_v37  ;;  %526 = vmatpush.msra.mxu1 %v473_v39  ;;  %v601_v37 = vld [vmem:[#allocation6 + $0x490] sm:$0xff]  ;;  %v602_v38 = vld [vmem:[#allocation6 + $0x498] sm:$0xff]  ;;  %v338_v39 = vld [vmem:[#allocation7] ss:$8 sm:$0x3] }
  0x70   :  { %566 = vmatpush.msra.mxu3 %v474_v40  ;;  %548 = vmatpush.msra.mxu2 %v438_v43  ;;  %v635_v40 = vld [vmem:[#allocation6 + $0x5a0] sm:$0xff]  ;;  %v600_v43 = vld [vmem:[#allocation6 + $0x488] sm:$0xff] }
  0x71   :  { %508 = vmatpush.msra.mxu0 %v437_v42  ;;  %527 = vmatpush.msra.mxu1 %v471_v58  ;;  %v599_v42 = vld [vmem:[#allocation6 + $0x480] sm:$0xff] }
  0x72   :  { %549 = vmatpush.msra.mxu2 %v436_v45  ;;  %567 = vmatpush.msra.mxu3 %v472_v60  ;;  %v597_v45 = vld [vmem:[#allocation6 + $0x470] sm:$0xff]  ;;  %v595_v60 = vld [vmem:[#allocation6 + $0x460] sm:$0xff] }
  0x73   :  { %509 = vmatpush.msra.mxu0 %v435_v44  ;;  %528 = vmatpush.msra.mxu1 %v469_v62  ;;  %v340_v44 = vperm.slane %v338_v39, 0  ;;  %v596_v62 = vld [vmem:[#allocation6 + $0x468] sm:$0xff] }
  0x74   :  { %550 = vmatpush.msra.mxu2 %v434_v59  ;;  %568 = vmatpush.msra.mxu3 %v470_v0  ;;  %v593_v0 = vld [vmem:[#allocation6 + $0x450] sm:$0xff] }
  0x75   :  { %510 = vmatpush.msra.mxu0 %v433_v57  ;;  %529 = vmatpush.msra.mxu1 %v467_v2  ;;  %v594_v2 = vld [vmem:[#allocation6 + $0x458] sm:$0xff] }
  0x76   :  { %551 = vmatpush.msra.mxu2 %v432_v63  ;;  %569 = vmatpush.msra.mxu3 %v468_v4  ;;  %v634_v63 = vld [vmem:[#allocation6 + $0x598] sm:$0xff]  ;;  %v591_v4 = vld [vmem:[#allocation6 + $0x440] sm:$0xff] }
  0x77   :  { %511 = vmatpush.msra.mxu0 %v431_v61  ;;  %530 = vmatpush.msra.mxu1 %v465_v6  ;;  %v633_v61 = vld [vmem:[#allocation6 + $0x590] sm:$0xff]  ;;  %v592_v6 = vld [vmem:[#allocation6 + $0x448] sm:$0xff] }
  0x78   :  { %552 = vmatpush.msra.mxu2 %v430_v3  ;;  %570 = vmatpush.msra.mxu3 %v466_v8  ;;  %v632_v3 = vld [vmem:[#allocation6 + $0x588] sm:$0xff]  ;;  %v589_v8 = vld [vmem:[#allocation6 + $0x430] sm:$0xff] }
  0x79   :  { %512 = vmatpush.msra.mxu0 %v429_v1  ;;  %531 = vmatpush.msra.mxu1 %v463_v9  ;;  %v631_v1 = vld [vmem:[#allocation6 + $0x580] sm:$0xff] }
  0x7a   :  { %553 = vmatpush.msra.mxu2 %v428_v7  ;;  %571 = vmatpush.msra.mxu3 %v464_v10  ;;  %v630_v7 = vld [vmem:[#allocation6 + $0x578] sm:$0xff]  ;;  %v627_v9 = vld [vmem:[#allocation6 + $0x560] sm:$0xff] }
  0x7b   :  { %513 = vmatpush.msra.mxu0 %v427_v5  ;;  %532 = vmatpush.msra.mxu1 %v461_v11  ;;  %v629_v5 = vld [vmem:[#allocation6 + $0x570] sm:$0xff]  ;;  %v590_v10 = vld [vmem:[#allocation6 + $0x438] sm:$0xff]  ;;  %v628_v11 = vld [vmem:[#allocation6 + $0x568] sm:$0xff] }
  0x7c   :  { %572 = vmatpush.msra.mxu3 %v462_v12  ;;  %v587_v12 = vld [vmem:[#allocation6 + $0x420] sm:$0xff] }
  0x7d   :  { %533 = vmatpush.msra.mxu1 %v459_v13  ;;  %v625_v13 = vld [vmem:[#allocation6 + $0x550] sm:$0xff] }
  0x7e   :  { %573 = vmatpush.msra.mxu3 %v460_v14  ;;  %v588_v14 = vld [vmem:[#allocation6 + $0x428] sm:$0xff] }
  0xb9   :  { %v209_v46 = vpop.f32.mrf.mxu0 }
  0xba   :  { %v210_v47 = vadd.f32 %v209_v46, %v188_v41  ;;  %v636_v41 = vld [vmem:[#allocation6 + $0x5a8] sm:$0xff]  ;;  %v598_v46 = vld [vmem:[#allocation6 + $0x478] sm:$0xff] }
  0xbb   :  { %v229_v49 = vpop.f32.mrf.mxu1 }
  0xbc   :  { %v230_v50 = vadd.f32 %v229_v49, %v210_v47  ;;  %v341_v49 = vperm.slane %v338_v39, 1  ;;  %v761_v39 = vld [vmem:[#allocation6 + $0x6c0] sm:$0xff] }
  0xbd   :  { %v249_v51 = vpop.f32.mrf.mxu2 }
  0xbe   :  { %v269_v52 = vpop.f32.mrf.mxu3  ;;  %v2206_v53 = vmax.f32 %v230_v50, 0.0  ;;  %v250_v54 = vadd.f32 %v249_v51, %v189_v48 }
  0xc0   :  { %v270_v55 = vadd.f32 %v269_v52, %v250_v54  ;;  %360 = vmatmul.f32.vlgmr.msrb.gmra.mxu0 %v2206_v53  ;;  %400 = vmatmul.f32.vlgmr.msrb.gmra.mxu2 %v2206_v53 }
  0xc1   :  { %654 = vmatpush.msrb.mxu0 %v613_v15  ;;  %694 = vmatpush.msrb.mxu2 %v614_v16  ;;  %v626_v15 = vld [vmem:[#allocation6 + $0x558] sm:$0xff]  ;;  %v585_v16 = vld [vmem:[#allocation6 + $0x410] sm:$0xff] }
  0xc2   :  { %v2210_v56 = vmax.f32 %v270_v55, 0.0 }
  0xc3   :  { %655 = vmatpush.msrb.mxu0 %v611_v17  ;;  %695 = vmatpush.msrb.mxu2 %v612_v18  ;;  %v623_v17 = vld [vmem:[#allocation6 + $0x540] sm:$0xff]  ;;  %v586_v18 = vld [vmem:[#allocation6 + $0x418] sm:$0xff] }
  0xc4   :  { %380 = vmatmul.f32.vlgmr.msrb.gmra.mxu1 %v2210_v56  ;;  %420 = vmatmul.f32.vlgmr.msrb.gmra.mxu3 %v2210_v56 }
  0xc5   :  { %674 = vmatpush.msrb.mxu1 %v645_v21  ;;  %714 = vmatpush.msrb.mxu3 %v646_v22  ;;  %v621_v21 = vld [vmem:[#allocation6 + $0x530] sm:$0xff]  ;;  %v584_v22 = vld [vmem:[#allocation6 + $0x408] sm:$0xff] }
  0xc6   :  { %656 = vmatpush.msrb.mxu0 %v609_v19  ;;  %696 = vmatpush.msrb.mxu2 %v610_v20  ;;  %v624_v19 = vld [vmem:[#allocation6 + $0x548] sm:$0xff]  ;;  %v583_v20 = vld [vmem:[#allocation6 + $0x400] sm:$0xff] }
  0xc7   :  { %675 = vmatpush.msrb.mxu1 %v643_v23  ;;  %715 = vmatpush.msrb.mxu3 %v644_v26  ;;  %v622_v23 = vld [vmem:[#allocation6 + $0x538] sm:$0xff]  ;;  %v617_v26 = vld [vmem:[#allocation6 + $0x510] sm:$0xff] }
  0xc8   :  { %657 = vmatpush.msrb.mxu0 %v607_v24  ;;  %697 = vmatpush.msrb.mxu2 %v608_v25  ;;  %v619_v24 = vld [vmem:[#allocation6 + $0x520] sm:$0xff]  ;;  %v620_v25 = vld [vmem:[#allocation6 + $0x528] sm:$0xff] }
  0xc9   :  { %676 = vmatpush.msrb.mxu1 %v641_v27  ;;  %716 = vmatpush.msrb.mxu3 %v642_v28  ;;  %v618_v27 = vld [vmem:[#allocation6 + $0x518] sm:$0xff]  ;;  %v615_v28 = vld [vmem:[#allocation6 + $0x500] sm:$0xff] }
  0xca   :  { %658 = vmatpush.msrb.mxu0 %v605_v29  ;;  %698 = vmatpush.msrb.mxu2 %v606_v30  ;;  %v616_v29 = vld [vmem:[#allocation6 + $0x508] sm:$0xff]  ;;  %v767_v30 = vld [vmem:[#allocation6 + $0x6f0] sm:$0xff] }
  0xcb   :  { %677 = vmatpush.msrb.mxu1 %v639_v31  ;;  %717 = vmatpush.msrb.mxu3 %v640_v32  ;;  %v768_v31 = vld [vmem:[#allocation6 + $0x6f8] sm:$0xff]  ;;  %v765_v32 = vld [vmem:[#allocation6 + $0x6e0] sm:$0xff] }
  0xcc   :  { %659 = vmatpush.msrb.mxu0 %v603_v33  ;;  %699 = vmatpush.msrb.mxu2 %v604_v34  ;;  %v766_v33 = vld [vmem:[#allocation6 + $0x6e8] sm:$0xff]  ;;  %v763_v34 = vld [vmem:[#allocation6 + $0x6d0] sm:$0xff] }
  0xcd   :  { %678 = vmatpush.msrb.mxu1 %v637_v35  ;;  %718 = vmatpush.msrb.mxu3 %v638_v36  ;;  %v764_v35 = vld [vmem:[#allocation6 + $0x6d8] sm:$0xff]  ;;  %v799_v36 = vld [vmem:[#allocation6 + $0x7f0] sm:$0xff] }
  0xce   :  { %660 = vmatpush.msrb.mxu0 %v601_v37  ;;  %700 = vmatpush.msrb.mxu2 %v602_v38  ;;  %v800_v37 = vld [vmem:[#allocation6 + $0x7f8] sm:$0xff]  ;;  %v797_v38 = vld [vmem:[#allocation6 + $0x7e0] sm:$0xff] }
  0xcf   :  { %679 = vmatpush.msrb.mxu1 %v635_v40  ;;  %719 = vmatpush.msrb.mxu3 %v636_v41  ;;  %v762_v40 = vld [vmem:[#allocation6 + $0x6c8] sm:$0xff] }
  0xd0   :  { %661 = vmatpush.msrb.mxu0 %v599_v42  ;;  %701 = vmatpush.msrb.mxu2 %v600_v43  ;;  %v798_v41 = vld [vmem:[#allocation6 + $0x7e8] sm:$0xff]  ;;  %v795_v42 = vld [vmem:[#allocation6 + $0x7d0] sm:$0xff]  ;;  %v796_v43 = vld [vmem:[#allocation6 + $0x7d8] sm:$0xff] }
  0xd1   :  { %680 = vmatpush.msrb.mxu1 %v633_v61  ;;  %720 = vmatpush.msrb.mxu3 %v634_v63  ;;  %v787_v61 = vld [vmem:[#allocation6 + $0x790] sm:$0xff] }
  0xd2   :  { %662 = vmatpush.msrb.mxu0 %v597_v45  ;;  %702 = vmatpush.msrb.mxu2 %v598_v46  ;;  %v760_v45 = vld [vmem:[#allocation6 + $0x6b8] sm:$0xff]  ;;  %v793_v46 = vld [vmem:[#allocation6 + $0x7c0] sm:$0xff] }
  0xd3   :  { %681 = vmatpush.msrb.mxu1 %v631_v1  ;;  %721 = vmatpush.msrb.mxu3 %v632_v3  ;;  %v752_v1 = vld [vmem:[#allocation6 + $0x678] sm:$0xff]  ;;  %v749_v3 = vld [vmem:[#allocation6 + $0x660] sm:$0xff] }
  0xd4   :  { %663 = vmatpush.msrb.mxu0 %v595_v60  ;;  %703 = vmatpush.msrb.mxu2 %v596_v62  ;;  %v754_v60 = vld [vmem:[#allocation6 + $0x688] sm:$0xff]  ;;  %v788_v62 = vld [vmem:[#allocation6 + $0x798] sm:$0xff] }
  0xd5   :  { %682 = vmatpush.msrb.mxu1 %v629_v5  ;;  %722 = vmatpush.msrb.mxu3 %v630_v7 }
  0xd6   :  { %664 = vmatpush.msrb.mxu0 %v593_v0  ;;  %704 = vmatpush.msrb.mxu2 %v594_v2  ;;  %v751_v0 = vld [vmem:[#allocation6 + $0x670] sm:$0xff] }
  0xd7   :  { %683 = vmatpush.msrb.mxu1 %v627_v9  ;;  %723 = vmatpush.msrb.mxu3 %v628_v11 }
  0xd8   :  { %665 = vmatpush.msrb.mxu0 %v591_v4  ;;  %705 = vmatpush.msrb.mxu2 %v592_v6  ;;  %v750_v4 = vld [vmem:[#allocation6 + $0x668] sm:$0xff] }
  0xd9   :  { %684 = vmatpush.msrb.mxu1 %v625_v13  ;;  %724 = vmatpush.msrb.mxu3 %v626_v15 }
  0xda   :  { %666 = vmatpush.msrb.mxu0 %v589_v8  ;;  %706 = vmatpush.msrb.mxu2 %v590_v10 }
  0xdb   :  { %685 = vmatpush.msrb.mxu1 %v623_v17  ;;  %725 = vmatpush.msrb.mxu3 %v624_v19  ;;  %v747_v17 = vld [vmem:[#allocation6 + $0x650] sm:$0xff]  ;;  %v786_v19 = vld [vmem:[#allocation6 + $0x788] sm:$0xff] }
  0xdc   :  { %667 = vmatpush.msrb.mxu0 %v587_v12  ;;  %707 = vmatpush.msrb.mxu2 %v588_v14 }
  0xdd   :  { %686 = vmatpush.msrb.mxu1 %v621_v21  ;;  %726 = vmatpush.msrb.mxu3 %v622_v23  ;;  %v783_v21 = vld [vmem:[#allocation6 + $0x770] sm:$0xff] }
  0xde   :  { %668 = vmatpush.msrb.mxu0 %v585_v16  ;;  %708 = vmatpush.msrb.mxu2 %v586_v18  ;;  %v785_v18 = vld [vmem:[#allocation6 + $0x780] sm:$0xff]  ;;  %v743_v23 = vld [vmem:[#allocation6 + $0x630] sm:$0xff] }
  0xdf   :  { %687 = vmatpush.msrb.mxu1 %v619_v24  ;;  %727 = vmatpush.msrb.mxu3 %v620_v25  ;;  %v781_v24 = vld [vmem:[#allocation6 + $0x760] sm:$0xff]  ;;  %v744_v25 = vld [vmem:[#allocation6 + $0x638] sm:$0xff] }
  0xe0   :  { %669 = vmatpush.msrb.mxu0 %v583_v20  ;;  %709 = vmatpush.msrb.mxu2 %v584_v22  ;;  %v745_v20 = vld [vmem:[#allocation6 + $0x640] sm:$0xff]  ;;  %v746_v22 = vld [vmem:[#allocation6 + $0x648] sm:$0xff] }
  0xe1   :  { %688 = vmatpush.msrb.mxu1 %v617_v26  ;;  %728 = vmatpush.msrb.mxu3 %v618_v27  ;;  %v782_v26 = vld [vmem:[#allocation6 + $0x768] sm:$0xff]  ;;  %v741_v27 = vld [vmem:[#allocation6 + $0x620] sm:$0xff] }
  0xe3   :  { %689 = vmatpush.msrb.mxu1 %v615_v28  ;;  %729 = vmatpush.msrb.mxu3 %v616_v29  ;;  %v779_v28 = vld [vmem:[#allocation6 + $0x750] sm:$0xff]  ;;  %v742_v29 = vld [vmem:[#allocation6 + $0x628] sm:$0xff] }
 0x13d   :  { %v361_v47 = vpop.f32.mrf.mxu0 }
 0x13e   :  { %v362_v48 = vadd.f32 %v361_v47, %v340_v44  ;;  %v759_v44 = vld [vmem:[#allocation6 + $0x6b0] sm:$0xff]  ;;  %v794_v47 = vld [vmem:[#allocation6 + $0x7c8] sm:$0xff] }
 0x141   :  { %v381_v50 = vpop.f32.mrf.mxu1 }
 0x142   :  { %v382_v51 = vadd.f32 %v381_v50, %v362_v48  ;;  %v757_v48 = vld [vmem:[#allocation6 + $0x6a0] sm:$0xff]  ;;  %v791_v50 = vld [vmem:[#allocation6 + $0x7b0] sm:$0xff] }
 0x143   :  { %v401_v52 = vpop.f32.mrf.mxu2 }
 0x144   :  { %v424_v54 = vmax.f32 %v382_v51, 0.0  ;;  %v402_v55 = vadd.f32 %v401_v52, %v341_v49  ;;  %v758_v49 = vld [vmem:[#allocation6 + $0x6a8] sm:$0xff]  ;;  %v792_v51 = vld [vmem:[#allocation6 + $0x7b8] sm:$0xff]  ;;  %v755_v52 = vld [vmem:[#allocation6 + $0x690] sm:$0xff] }
 0x146   :  { %514 = vmatmul.f32.vlgmr.msra.gmra.mxu0 %v424_v54  ;;  %554 = vmatmul.f32.vlgmr.msra.gmra.mxu2 %v424_v54  ;;  %v756_v54 = vld [vmem:[#allocation6 + $0x698] sm:$0xff] }
 0x147   :  { %v421_v57 = vpop.f32.mrf.mxu3  ;;  %808 = vmatpush.msra.mxu0 %v767_v30  ;;  %848 = vmatpush.msra.mxu2 %v768_v31  ;;  %v780_v30 = vld [vmem:[#allocation6 + $0x758] sm:$0xff]  ;;  %v739_v31 = vld [vmem:[#allocation6 + $0x610] sm:$0xff] }
 0x148   :  { %v422_v58 = vadd.f32 %v421_v57, %v402_v55  ;;  %v492_v55 = vld [vmem:[#allocation7 + $0x1] ss:$8 sm:$0x3] }
 0x149   :  { %809 = vmatpush.msra.mxu0 %v765_v32  ;;  %849 = vmatpush.msra.mxu2 %v766_v33  ;;  %v789_v57 = vld [vmem:[#allocation6 + $0x7a0] sm:$0xff]  ;;  %v494_v63 = vperm.slane %v492_v55, 0  ;;  %v495_v8 = vperm.slane %v492_v55, 1  ;;  %v740_v33 = vld [vmem:[#allocation6 + $0x618] sm:$0xff] }
 0x14a   :  { %v425_v59 = vmax.f32 %v422_v58, 0.0  ;;  %v790_v58 = vld [vmem:[#allocation6 + $0x7a8] sm:$0xff]  ;;  %v777_v32 = vld [vmem:[#allocation6 + $0x740] sm:$0xff] }
 0x14b   :  { %810 = vmatpush.msra.mxu0 %v763_v34  ;;  %850 = vmatpush.msra.mxu2 %v764_v35  ;;  %v778_v34 = vld [vmem:[#allocation6 + $0x748] sm:$0xff]  ;;  %v737_v35 = vld [vmem:[#allocation6 + $0x600] sm:$0xff] }
 0x14c   :  { %534 = vmatmul.f32.vlgmr.msra.gmra.mxu1 %v425_v59  ;;  %574 = vmatmul.f32.vlgmr.msra.gmra.mxu3 %v425_v59  ;;  %v753_v59 = vld [vmem:[#allocation6 + $0x680] sm:$0xff] }
 0x14d   :  { %828 = vmatpush.msra.mxu1 %v799_v36  ;;  %868 = vmatpush.msra.mxu3 %v800_v37  ;;  %v775_v36 = vld [vmem:[#allocation6 + $0x730] sm:$0xff]  ;;  %v738_v37 = vld [vmem:[#allocation6 + $0x608] sm:$0xff]  ;;  %v917_v55 = vld [vmem:[#allocation6 + $0x8c0] sm:$0xff] }
 0x14e   :  { %811 = vmatpush.msra.mxu0 %v761_v39  ;;  %851 = vmatpush.msra.mxu2 %v762_v40  ;;  %v773_v39 = vld [vmem:[#allocation6 + $0x720] sm:$0xff]  ;;  %v774_v40 = vld [vmem:[#allocation6 + $0x728] sm:$0xff] }
 0x14f   :  { %829 = vmatpush.msra.mxu1 %v797_v38  ;;  %869 = vmatpush.msra.mxu3 %v798_v41  ;;  %v776_v38 = vld [vmem:[#allocation6 + $0x738] sm:$0xff]  ;;  %v771_v41 = vld [vmem:[#allocation6 + $0x710] sm:$0xff] }
 0x150   :  { %812 = vmatpush.msra.mxu0 %v759_v44  ;;  %852 = vmatpush.msra.mxu2 %v760_v45  ;;  %v770_v44 = vld [vmem:[#allocation6 + $0x708] sm:$0xff]  ;;  %v923_v45 = vld [vmem:[#allocation6 + $0x8f0] sm:$0xff] }
 0x151   :  { %830 = vmatpush.msra.mxu1 %v795_v42  ;;  %870 = vmatpush.msra.mxu3 %v796_v43  ;;  %v772_v42 = vld [vmem:[#allocation6 + $0x718] sm:$0xff]  ;;  %v769_v43 = vld [vmem:[#allocation6 + $0x700] sm:$0xff] }
 0x152   :  { %813 = vmatpush.msra.mxu0 %v757_v48  ;;  %853 = vmatpush.msra.mxu2 %v758_v49  ;;  %v922_v48 = vld [vmem:[#allocation6 + $0x8e8] sm:$0xff]  ;;  %v919_v49 = vld [vmem:[#allocation6 + $0x8d0] sm:$0xff] }
 0x153   :  { %831 = vmatpush.msra.mxu1 %v793_v46  ;;  %871 = vmatpush.msra.mxu3 %v794_v47  ;;  %v924_v46 = vld [vmem:[#allocation6 + $0x8f8] sm:$0xff]  ;;  %v921_v47 = vld [vmem:[#allocation6 + $0x8e0] sm:$0xff] }
 0x154   :  { %814 = vmatpush.msra.mxu0 %v755_v52  ;;  %854 = vmatpush.msra.mxu2 %v756_v54  ;;  %v956_v52 = vld [vmem:[#allocation6 + $0x9f8] sm:$0xff]  ;;  %v953_v54 = vld [vmem:[#allocation6 + $0x9e0] sm:$0xff] }
 0x155   :  { %832 = vmatpush.msra.mxu1 %v791_v50  ;;  %872 = vmatpush.msra.mxu3 %v792_v51  ;;  %v920_v50 = vld [vmem:[#allocation6 + $0x8d8] sm:$0xff]  ;;  %v955_v51 = vld [vmem:[#allocation6 + $0x9f0] sm:$0xff] }
 0x156   :  { %815 = vmatpush.msra.mxu0 %v753_v59  ;;  %855 = vmatpush.msra.mxu2 %v754_v60  ;;  %v951_v59 = vld [vmem:[#allocation6 + $0x9d0] sm:$0xff]  ;;  %v952_v60 = vld [vmem:[#allocation6 + $0x9d8] sm:$0xff] }
 0x157   :  { %833 = vmatpush.msra.mxu1 %v789_v57  ;;  %873 = vmatpush.msra.mxu3 %v790_v58  ;;  %v918_v57 = vld [vmem:[#allocation6 + $0x8c8] sm:$0xff] }
 0x158   :  { %816 = vmatpush.msra.mxu0 %v751_v0  ;;  %856 = vmatpush.msra.mxu2 %v752_v1  ;;  %v954_v58 = vld [vmem:[#allocation6 + $0x9e8] sm:$0xff]  ;;  %v913_v1 = vld [vmem:[#allocation6 + $0x8a0] sm:$0xff] }
 0x159   :  { %834 = vmatpush.msra.mxu1 %v787_v61  ;;  %874 = vmatpush.msra.mxu3 %v788_v62  ;;  %v915_v61 = vld [vmem:[#allocation6 + $0x8b0] sm:$0xff]  ;;  %v916_v62 = vld [vmem:[#allocation6 + $0x8b8] sm:$0xff]  ;;  %v950_v0 = vld [vmem:[#allocation6 + $0x9c8] sm:$0xff] }
 0x15a   :  { %817 = vmatpush.msra.mxu0 %v749_v3  ;;  %857 = vmatpush.msra.mxu2 %v750_v4  ;;  %v947_v3 = vld [vmem:[#allocation6 + $0x9b0] sm:$0xff]  ;;  %v948_v4 = vld [vmem:[#allocation6 + $0x9b8] sm:$0xff] }
 0x15b   :  { %835 = vmatpush.msra.mxu1 %v785_v18  ;;  %875 = vmatpush.msra.mxu3 %v786_v19 }
 0x15c   :  { %818 = vmatpush.msra.mxu0 %v747_v17 }
 0x15d   :  { %836 = vmatpush.msra.mxu1 %v783_v21 }
 0x15e   :  { %819 = vmatpush.msra.mxu0 %v745_v20 }
 0x15f   :  { %837 = vmatpush.msra.mxu1 %v781_v24 }
 0x160   :  { %820 = vmatpush.msra.mxu0 %v743_v23 }
 0x161   :  { %838 = vmatpush.msra.mxu1 %v779_v28  ;;  %v906_v28 = vld [vmem:[#allocation6 + $0x868] sm:$0xff] }
 0x162   :  { %821 = vmatpush.msra.mxu0 %v741_v27  ;;  %v943_v27 = vld [vmem:[#allocation6 + $0x990] sm:$0xff] }
 0x163   :  { %839 = vmatpush.msra.mxu1 %v777_v32  ;;  %v904_v32 = vld [vmem:[#allocation6 + $0x858] sm:$0xff] }
 0x164   :  { %822 = vmatpush.msra.mxu0 %v739_v31  ;;  %v941_v31 = vld [vmem:[#allocation6 + $0x980] sm:$0xff] }
 0x165   :  { %840 = vmatpush.msra.mxu1 %v775_v36  ;;  %v902_v36 = vld [vmem:[#allocation6 + $0x848] sm:$0xff] }
 0x166   :  { %823 = vmatpush.msra.mxu0 %v737_v35  ;;  %v939_v35 = vld [vmem:[#allocation6 + $0x970] sm:$0xff] }
 0x167   :  { %841 = vmatpush.msra.mxu1 %v773_v39  ;;  %v937_v39 = vld [vmem:[#allocation6 + $0x960] sm:$0xff] }
 0x169   :  { %842 = vmatpush.msra.mxu1 %v771_v41  ;;  %v938_v41 = vld [vmem:[#allocation6 + $0x968] sm:$0xff] }
 0x16b   :  { %843 = vmatpush.msra.mxu1 %v769_v43  ;;  %v935_v43 = vld [vmem:[#allocation6 + $0x950] sm:$0xff] }
 0x1c3   :  { %v515_v2 = vpop.f32.mrf.mxu0 }
 0x1c4   :  { %v516_v5 = vadd.f32 %v515_v2, %v494_v63  ;;  %v949_v63 = vld [vmem:[#allocation6 + $0x9c0] sm:$0xff]  ;;  %v914_v2 = vld [vmem:[#allocation6 + $0x8a8] sm:$0xff] }
 0x1c9   :  { %v535_v6 = vpop.f32.mrf.mxu1  ;;  %v555_v9 = vpop.f32.mrf.mxu2 }
 0x1ca   :  { %v536_v7 = vadd.f32 %v535_v6, %v516_v5  ;;  %v556_v12 = vadd.f32 %v555_v9, %v495_v8  ;;  %v911_v5 = vld [vmem:[#allocation6 + $0x890] sm:$0xff]  ;;  %v912_v6 = vld [vmem:[#allocation6 + $0x898] sm:$0xff]  ;;  %v946_v8 = vld [vmem:[#allocation6 + $0x9a8] sm:$0xff] }
 0x1cb   :  { %v909_v9 = vld [vmem:[#allocation6 + $0x880] sm:$0xff] }
 0x1cc   :  { %v578_v10 = vadd.f32 %v536_v7, %v2206_v53  ;;  %v748_v53 = vld [vmem:[#allocation6 + $0x658] sm:$0xff]  ;;  %v945_v7 = vld [vmem:[#allocation6 + $0x9a0] sm:$0xff] }
 0x1cd   :  { %858 = vmatpush.msra.mxu2 %v748_v53 }
 0x1ce   :  { %v2215_v11 = vmax.f32 %v578_v10, 0.0  ;;  %v910_v10 = vld [vmem:[#allocation6 + $0x888] sm:$0xff] }
 0x1cf   :  { %v575_v13 = vpop.f32.mrf.mxu3  ;;  %859 = vmatpush.msra.mxu2 %v746_v22 }
 0x1d0   :  { %v576_v14 = vadd.f32 %v575_v13, %v556_v12  ;;  %670 = vmatmul.f32.vlgmr.msrb.gmra.mxu0 %v2215_v11  ;;  %710 = vmatmul.f32.vlgmr.msrb.gmra.mxu2 %v2215_v11  ;;  %v648_v12 = vld [vmem:[#allocation7 + $0x2] ss:$8 sm:$0x3]  ;;  %v907_v13 = vld [vmem:[#allocation6 + $0x870] sm:$0xff] }
 0x1d1   :  { %860 = vmatpush.msra.mxu2 %v744_v25  ;;  %964 = vmatpush.msrb.mxu0 %v923_v45  ;;  %v651_v20 = vperm.slane %v648_v12, 1  ;;  %v936_v45 = vld [vmem:[#allocation6 + $0x958] sm:$0xff] }
 0x1d2   :  { %v579_v15 = vadd.f32 %v576_v14, %v2210_v56  ;;  %v784_v56 = vld [vmem:[#allocation6 + $0x778] sm:$0xff] }
 0x1d3   :  { %876 = vmatpush.msra.mxu3 %v784_v56  ;;  %861 = vmatpush.msra.mxu2 %v742_v29  ;;  %v908_v14 = vld [vmem:[#allocation6 + $0x878] sm:$0xff] }
 0x1d4   :  { %v2220_v16 = vmax.f32 %v579_v15, 0.0  ;;  %965 = vmatpush.msrb.mxu0 %v921_v47  ;;  %v650_v15 = vperm.slane %v648_v12, 0  ;;  %v944_v29 = vld [vmem:[#allocation6 + $0x998] sm:$0xff]  ;;  %v933_v47 = vld [vmem:[#allocation6 + $0x940] sm:$0xff] }
 0x1d5   :  { %877 = vmatpush.msra.mxu3 %v782_v26  ;;  %862 = vmatpush.msra.mxu2 %v740_v33  ;;  %v905_v26 = vld [vmem:[#allocation6 + $0x860] sm:$0xff]  ;;  %v942_v33 = vld [vmem:[#allocation6 + $0x988] sm:$0xff]  ;;  %v1106_v12 = vld [vmem:[#allocation6 + $0xbd8] sm:$0xff] }
 0x1d6   :  { %690 = vmatmul.f32.vlgmr.msrb.gmra.mxu1 %v2220_v16  ;;  %730 = vmatmul.f32.vlgmr.msrb.gmra.mxu3 %v2220_v16 }
 0x1d7   :  { %878 = vmatpush.msra.mxu3 %v780_v30  ;;  %863 = vmatpush.msra.mxu2 %v738_v37  ;;  %v903_v30 = vld [vmem:[#allocation6 + $0x850] sm:$0xff]  ;;  %v940_v37 = vld [vmem:[#allocation6 + $0x978] sm:$0xff] }
 0x1d8   :  { %984 = vmatpush.msrb.mxu1 %v955_v51  ;;  %966 = vmatpush.msrb.mxu0 %v919_v49  ;;  %v934_v49 = vld [vmem:[#allocation6 + $0x948] sm:$0xff]  ;;  %v931_v51 = vld [vmem:[#allocation6 + $0x930] sm:$0xff] }
 0x1d9   :  { %879 = vmatpush.msra.mxu3 %v778_v34  ;;  %1004 = vmatpush.msrb.mxu2 %v924_v46  ;;  %v901_v34 = vld [vmem:[#allocation6 + $0x840] sm:$0xff]  ;;  %v895_v46 = vld [vmem:[#allocation6 + $0x810] sm:$0xff] }
 0x1da   :  { %985 = vmatpush.msrb.mxu1 %v953_v54  ;;  %967 = vmatpush.msrb.mxu0 %v917_v55  ;;  %v932_v54 = vld [vmem:[#allocation6 + $0x938] sm:$0xff]  ;;  %v929_v55 = vld [vmem:[#allocation6 + $0x920] sm:$0xff] }
 0x1db   :  { %880 = vmatpush.msra.mxu3 %v776_v38  ;;  %1005 = vmatpush.msrb.mxu2 %v922_v48  ;;  %v899_v38 = vld [vmem:[#allocation6 + $0x830] sm:$0xff]  ;;  %v896_v48 = vld [vmem:[#allocation6 + $0x818] sm:$0xff] }
 0x1dc   :  { %986 = vmatpush.msrb.mxu1 %v951_v59  ;;  %968 = vmatpush.msrb.mxu0 %v915_v61  ;;  %v928_v59 = vld [vmem:[#allocation6 + $0x918] sm:$0xff]  ;;  %v926_v61 = vld [vmem:[#allocation6 + $0x908] sm:$0xff] }
 0x1dd   :  { %881 = vmatpush.msra.mxu3 %v774_v40  ;;  %1006 = vmatpush.msrb.mxu2 %v920_v50  ;;  %v900_v40 = vld [vmem:[#allocation6 + $0x838] sm:$0xff]  ;;  %v893_v50 = vld [vmem:[#allocation6 + $0x800] sm:$0xff] }
 0x1de   :  { %987 = vmatpush.msrb.mxu1 %v949_v63  ;;  %969 = vmatpush.msrb.mxu0 %v913_v1  ;;  %v1078_v63 = vld [vmem:[#allocation6 + $0xaf8] sm:$0xff]  ;;  %v1076_v1 = vld [vmem:[#allocation6 + $0xae8] sm:$0xff] }
 0x1df   :  { %882 = vmatpush.msra.mxu3 %v772_v42  ;;  %1007 = vmatpush.msrb.mxu2 %v918_v57  ;;  %v897_v42 = vld [vmem:[#allocation6 + $0x820] sm:$0xff]  ;;  %v930_v57 = vld [vmem:[#allocation6 + $0x928] sm:$0xff] }
 0x1e0   :  { %988 = vmatpush.msrb.mxu1 %v947_v3  ;;  %970 = vmatpush.msrb.mxu0 %v911_v5  ;;  %v1074_v3 = vld [vmem:[#allocation6 + $0xad8] sm:$0xff] }
 0x1e1   :  { %883 = vmatpush.msra.mxu3 %v770_v44  ;;  %1008 = vmatpush.msrb.mxu2 %v916_v62  ;;  %v898_v44 = vld [vmem:[#allocation6 + $0x828] sm:$0xff]  ;;  %v1077_v62 = vld [vmem:[#allocation6 + $0xaf0] sm:$0xff]  ;;  %v1110_v5 = vld [vmem:[#allocation6 + $0xbf8] sm:$0xff] }
 0x1e2   :  { %989 = vmatpush.msrb.mxu1 %v945_v7  ;;  %971 = vmatpush.msrb.mxu0 %v909_v9  ;;  %v1071_v7 = vld [vmem:[#allocation6 + $0xac0] sm:$0xff]  ;;  %v1108_v9 = vld [vmem:[#allocation6 + $0xbe8] sm:$0xff] }
 0x1e3   :  { %1024 = vmatpush.msrb.mxu3 %v956_v52  ;;  %1009 = vmatpush.msrb.mxu2 %v914_v2  ;;  %v894_v52 = vld [vmem:[#allocation6 + $0x808] sm:$0xff]  ;;  %v1073_v2 = vld [vmem:[#allocation6 + $0xad0] sm:$0xff] }
 0x1e4   :  { %972 = vmatpush.msrb.mxu0 %v907_v13  ;;  %990 = vmatpush.msrb.mxu1 %v943_v27  ;;  %v1069_v13 = vld [vmem:[#allocation6 + $0xab0] sm:$0xff] }
 0x1e5   :  { %1025 = vmatpush.msrb.mxu3 %v954_v58  ;;  %1010 = vmatpush.msrb.mxu2 %v912_v6  ;;  %v927_v58 = vld [vmem:[#allocation6 + $0x910] sm:$0xff]  ;;  %v1107_v6 = vld [vmem:[#allocation6 + $0xbe0] sm:$0xff] }
 0x1e6   :  { %973 = vmatpush.msrb.mxu0 %v905_v26  ;;  %991 = vmatpush.msrb.mxu1 %v941_v31  ;;  %v1064_v26 = vld [vmem:[#allocation6 + $0xa88] sm:$0xff]  ;;  %v1097_v27 = vld [vmem:[#allocation6 + $0xb90] sm:$0xff]  ;;  %v1062_v31 = vld [vmem:[#allocation6 + $0xa78] sm:$0xff] }
 0x1e7   :  { %1026 = vmatpush.msrb.mxu3 %v952_v60  ;;  %1011 = vmatpush.msrb.mxu2 %v910_v10  ;;  %v925_v60 = vld [vmem:[#allocation6 + $0x900] sm:$0xff]  ;;  %v1105_v10 = vld [vmem:[#allocation6 + $0xbd0] sm:$0xff] }
 0x1e8   :  { %974 = vmatpush.msrb.mxu0 %v903_v30  ;;  %992 = vmatpush.msrb.mxu1 %v939_v35  ;;  %v1061_v30 = vld [vmem:[#allocation6 + $0xa70] sm:$0xff] }
 0x1e9   :  { %1027 = vmatpush.msrb.mxu3 %v950_v0  ;;  %1012 = vmatpush.msrb.mxu2 %v908_v14  ;;  %v1075_v0 = vld [vmem:[#allocation6 + $0xae0] sm:$0xff]  ;;  %v1070_v14 = vld [vmem:[#allocation6 + $0xab8] sm:$0xff] }
 0x1ea   :  { %975 = vmatpush.msrb.mxu0 %v901_v34  ;;  %993 = vmatpush.msrb.mxu1 %v937_v39  ;;  %v1060_v34 = vld [vmem:[#allocation6 + $0xa68] sm:$0xff] }
 0x1eb   :  { %1028 = vmatpush.msrb.mxu3 %v948_v4  ;;  %1013 = vmatpush.msrb.mxu2 %v906_v28  ;;  %v1109_v4 = vld [vmem:[#allocation6 + $0xbf0] sm:$0xff]  ;;  %v1098_v28 = vld [vmem:[#allocation6 + $0xb98] sm:$0xff] }
 0x1ec   :  { %976 = vmatpush.msrb.mxu0 %v899_v38  ;;  %994 = vmatpush.msrb.mxu1 %v935_v43 }
 0x1ed   :  { %1029 = vmatpush.msrb.mxu3 %v946_v8  ;;  %1014 = vmatpush.msrb.mxu2 %v904_v32  ;;  %v1072_v8 = vld [vmem:[#allocation6 + $0xac8] sm:$0xff] }
 0x1ee   :  { %977 = vmatpush.msrb.mxu0 %v897_v42  ;;  %995 = vmatpush.msrb.mxu1 %v933_v47  ;;  %v1057_v47 = vld [vmem:[#allocation6 + $0xa50] sm:$0xff] }
 0x1ef   :  { %1030 = vmatpush.msrb.mxu3 %v944_v29  ;;  %1015 = vmatpush.msrb.mxu2 %v902_v36 }
 0x1f0   :  { %978 = vmatpush.msrb.mxu0 %v895_v46  ;;  %996 = vmatpush.msrb.mxu1 %v931_v51  ;;  %v1093_v51 = vld [vmem:[#allocation6 + $0xb70] sm:$0xff] }
 0x1f1   :  { %1031 = vmatpush.msrb.mxu3 %v942_v33  ;;  %1016 = vmatpush.msrb.mxu2 %v900_v40  ;;  %v1059_v33 = vld [vmem:[#allocation6 + $0xa60] sm:$0xff] }
 0x1f2   :  { %979 = vmatpush.msrb.mxu0 %v893_v50  ;;  %997 = vmatpush.msrb.mxu1 %v929_v55  ;;  %v1055_v50 = vld [vmem:[#allocation6 + $0xa40] sm:$0xff] }
 0x1f3   :  { %1032 = vmatpush.msrb.mxu3 %v940_v37  ;;  %1017 = vmatpush.msrb.mxu2 %v898_v44  ;;  %v1091_v55 = vld [vmem:[#allocation6 + $0xb60] sm:$0xff] }
 0x1f4   :  { %998 = vmatpush.msrb.mxu1 %v927_v58  ;;  %v1092_v58 = vld [vmem:[#allocation6 + $0xb68] sm:$0xff] }
 0x1f5   :  { %1033 = vmatpush.msrb.mxu3 %v938_v41  ;;  %1018 = vmatpush.msrb.mxu2 %v896_v48  ;;  %v1095_v48 = vld [vmem:[#allocation6 + $0xb80] sm:$0xff] }
 0x1f6   :  { %999 = vmatpush.msrb.mxu1 %v925_v60  ;;  %v1089_v60 = vld [vmem:[#allocation6 + $0xb50] sm:$0xff] }
 0x1f7   :  { %1034 = vmatpush.msrb.mxu3 %v936_v45  ;;  %1019 = vmatpush.msrb.mxu2 %v894_v52  ;;  %v1056_v52 = vld [vmem:[#allocation6 + $0xa48] sm:$0xff] }
 0x1f9   :  { %1035 = vmatpush.msrb.mxu3 %v934_v49  ;;  %v1096_v49 = vld [vmem:[#allocation6 + $0xb88] sm:$0xff] }
 0x1fb   :  { %1036 = vmatpush.msrb.mxu3 %v932_v54  ;;  %v1053_v54 = vld [vmem:[#allocation6 + $0xa30] sm:$0xff] }
 0x1fd   :  { %1037 = vmatpush.msrb.mxu3 %v930_v57  ;;  %v1054_v57 = vld [vmem:[#allocation6 + $0xa38] sm:$0xff] }
 0x1ff   :  { %1038 = vmatpush.msrb.mxu3 %v928_v59  ;;  %v1051_v59 = vld [vmem:[#allocation6 + $0xa20] sm:$0xff] }
 0x201   :  { %1039 = vmatpush.msrb.mxu3 %v926_v61  ;;  %v1052_v61 = vld [vmem:[#allocation6 + $0xa28] sm:$0xff] }
 0x24d   :  { %v671_v17 = vpop.f32.mrf.mxu0 }
 0x24e   :  { %v672_v18 = vadd.f32 %v671_v17, %v650_v15  ;;  %v1103_v15 = vld [vmem:[#allocation6 + $0xbc0] sm:$0xff]  ;;  %v1104_v17 = vld [vmem:[#allocation6 + $0xbc8] sm:$0xff] }
 0x253   :  { %v691_v53 = vpop.f32.mrf.mxu1  ;;  %v711_v21 = vpop.f32.mrf.mxu2 }
 0x254   :  { %v692_v19 = vadd.f32 %v691_v53, %v672_v18  ;;  %v712_v56 = vadd.f32 %v711_v21, %v651_v20  ;;  %v1067_v18 = vld [vmem:[#allocation6 + $0xaa0] sm:$0xff]  ;;  %v1068_v53 = vld [vmem:[#allocation6 + $0xaa8] sm:$0xff]  ;;  %v1102_v20 = vld [vmem:[#allocation6 + $0xbb8] sm:$0xff] }
 0x255   :  { %v1065_v21 = vld [vmem:[#allocation6 + $0xa90] sm:$0xff] }
 0x256   :  { %v734_v22 = vmax.f32 %v692_v19, 0.0  ;;  %v1101_v19 = vld [vmem:[#allocation6 + $0xbb0] sm:$0xff] }
 0x258   :  { %824 = vmatmul.f32.vlgmr.msra.gmra.mxu0 %v734_v22  ;;  %864 = vmatmul.f32.vlgmr.msra.gmra.mxu2 %v734_v22  ;;  %v1066_v22 = vld [vmem:[#allocation6 + $0xa98] sm:$0xff] }
 0x259   :  { %v731_v23 = vpop.f32.mrf.mxu3  ;;  %1118 = vmatpush.msra.mxu0 %v1077_v62  ;;  %1158 = vmatpush.msra.mxu2 %v1078_v63  ;;  %v1090_v62 = vld [vmem:[#allocation6 + $0xb58] sm:$0xff]  ;;  %v1049_v63 = vld [vmem:[#allocation6 + $0xa10] sm:$0xff] }
 0x25a   :  { %v732_v24 = vadd.f32 %v731_v23, %v712_v56  ;;  %v802_v56 = vld [vmem:[#allocation7 + $0x3] ss:$8 sm:$0x3] }
 0x25b   :  { %1119 = vmatpush.msra.mxu0 %v1075_v0  ;;  %1159 = vmatpush.msra.mxu2 %v1076_v1  ;;  %v1099_v23 = vld [vmem:[#allocation6 + $0xba0] sm:$0xff]  ;;  %v804_v29 = vperm.slane %v802_v56, 0  ;;  %v805_v38 = vperm.slane %v802_v56, 1  ;;  %v1050_v1 = vld [vmem:[#allocation6 + $0xa18] sm:$0xff] }
 0x25c   :  { %v735_v25 = vmax.f32 %v732_v24, 0.0  ;;  %v1100_v24 = vld [vmem:[#allocation6 + $0xba8] sm:$0xff]  ;;  %v1087_v0 = vld [vmem:[#allocation6 + $0xb40] sm:$0xff] }
 0x25d   :  { %1120 = vmatpush.msra.mxu0 %v1073_v2  ;;  %1160 = vmatpush.msra.mxu2 %v1074_v3  ;;  %v1088_v2 = vld [vmem:[#allocation6 + $0xb48] sm:$0xff]  ;;  %v1047_v3 = vld [vmem:[#allocation6 + $0xa00] sm:$0xff] }
 0x25e   :  { %844 = vmatmul.f32.vlgmr.msra.gmra.mxu1 %v735_v25  ;;  %884 = vmatmul.f32.vlgmr.msra.gmra.mxu3 %v735_v25  ;;  %v1063_v25 = vld [vmem:[#allocation6 + $0xa80] sm:$0xff] }
 0x25f   :  { %1138 = vmatpush.msra.mxu1 %v1109_v4  ;;  %1178 = vmatpush.msra.mxu3 %v1110_v5  ;;  %v1085_v4 = vld [vmem:[#allocation6 + $0xb30] sm:$0xff]  ;;  %v1048_v5 = vld [vmem:[#allocation6 + $0xa08] sm:$0xff]  ;;  %v1227_v56 = vld [vmem:[#allocation6 + $0xcc0] sm:$0xff] }
 0x260   :  { %1121 = vmatpush.msra.mxu0 %v1071_v7  ;;  %1161 = vmatpush.msra.mxu2 %v1072_v8  ;;  %v1083_v7 = vld [vmem:[#allocation6 + $0xb20] sm:$0xff]  ;;  %v1084_v8 = vld [vmem:[#allocation6 + $0xb28] sm:$0xff] }
 0x261   :  { %1139 = vmatpush.msra.mxu1 %v1107_v6  ;;  %1179 = vmatpush.msra.mxu3 %v1108_v9  ;;  %v1086_v6 = vld [vmem:[#allocation6 + $0xb38] sm:$0xff]  ;;  %v1081_v9 = vld [vmem:[#allocation6 + $0xb10] sm:$0xff] }
 0x262   :  { %1122 = vmatpush.msra.mxu0 %v1069_v13  ;;  %1162 = vmatpush.msra.mxu2 %v1070_v14  ;;  %v1080_v13 = vld [vmem:[#allocation6 + $0xb08] sm:$0xff]  ;;  %v1233_v14 = vld [vmem:[#allocation6 + $0xcf0] sm:$0xff] }
 0x263   :  { %1140 = vmatpush.msra.mxu1 %v1105_v10  ;;  %1180 = vmatpush.msra.mxu3 %v1106_v12  ;;  %v1082_v10 = vld [vmem:[#allocation6 + $0xb18] sm:$0xff]  ;;  %v1079_v12 = vld [vmem:[#allocation6 + $0xb00] sm:$0xff] }
 0x264   :  { %1123 = vmatpush.msra.mxu0 %v1067_v18  ;;  %1163 = vmatpush.msra.mxu2 %v1068_v53  ;;  %v1232_v18 = vld [vmem:[#allocation6 + $0xce8] sm:$0xff]  ;;  %v1229_v53 = vld [vmem:[#allocation6 + $0xcd0] sm:$0xff] }
 0x265   :  { %1141 = vmatpush.msra.mxu1 %v1103_v15  ;;  %1181 = vmatpush.msra.mxu3 %v1104_v17  ;;  %v1234_v15 = vld [vmem:[#allocation6 + $0xcf8] sm:$0xff]  ;;  %v1231_v17 = vld [vmem:[#allocation6 + $0xce0] sm:$0xff] }
 0x266   :  { %1124 = vmatpush.msra.mxu0 %v1065_v21  ;;  %1164 = vmatpush.msra.mxu2 %v1066_v22  ;;  %v1266_v21 = vld [vmem:[#allocation6 + $0xdf8] sm:$0xff]  ;;  %v1263_v22 = vld [vmem:[#allocation6 + $0xde0] sm:$0xff] }
 0x267   :  { %1142 = vmatpush.msra.mxu1 %v1101_v19  ;;  %1182 = vmatpush.msra.mxu3 %v1102_v20  ;;  %v1230_v19 = vld [vmem:[#allocation6 + $0xcd8] sm:$0xff]  ;;  %v1265_v20 = vld [vmem:[#allocation6 + $0xdf0] sm:$0xff] }
 0x268   :  { %1125 = vmatpush.msra.mxu0 %v1063_v25  ;;  %1165 = vmatpush.msra.mxu2 %v1064_v26  ;;  %v1261_v25 = vld [vmem:[#allocation6 + $0xdd0] sm:$0xff]  ;;  %v1262_v26 = vld [vmem:[#allocation6 + $0xdd8] sm:$0xff] }
 0x269   :  { %1143 = vmatpush.msra.mxu1 %v1099_v23  ;;  %1183 = vmatpush.msra.mxu3 %v1100_v24  ;;  %v1228_v23 = vld [vmem:[#allocation6 + $0xcc8] sm:$0xff] }
 0x26a   :  { %1126 = vmatpush.msra.mxu0 %v1061_v30  ;;  %1166 = vmatpush.msra.mxu2 %v1062_v31  ;;  %v1264_v24 = vld [vmem:[#allocation6 + $0xde8] sm:$0xff]  ;;  %v1223_v31 = vld [vmem:[#allocation6 + $0xca0] sm:$0xff] }
 0x26b   :  { %1144 = vmatpush.msra.mxu1 %v1097_v27  ;;  %1184 = vmatpush.msra.mxu3 %v1098_v28  ;;  %v1225_v27 = vld [vmem:[#allocation6 + $0xcb0] sm:$0xff]  ;;  %v1226_v28 = vld [vmem:[#allocation6 + $0xcb8] sm:$0xff]  ;;  %v1260_v30 = vld [vmem:[#allocation6 + $0xdc8] sm:$0xff] }
 0x26c   :  { %1127 = vmatpush.msra.mxu0 %v1059_v33  ;;  %1167 = vmatpush.msra.mxu2 %v1060_v34  ;;  %v1257_v33 = vld [vmem:[#allocation6 + $0xdb0] sm:$0xff]  ;;  %v1258_v34 = vld [vmem:[#allocation6 + $0xdb8] sm:$0xff] }
 0x26d   :  { %1145 = vmatpush.msra.mxu1 %v1095_v48  ;;  %1185 = vmatpush.msra.mxu3 %v1096_v49 }
 0x26e   :  { %1128 = vmatpush.msra.mxu0 %v1057_v47 }
 0x26f   :  { %1146 = vmatpush.msra.mxu1 %v1093_v51 }
 0x270   :  { %1129 = vmatpush.msra.mxu0 %v1055_v50 }
 0x271   :  { %1147 = vmatpush.msra.mxu1 %v1091_v55 }
 0x272   :  { %1130 = vmatpush.msra.mxu0 %v1053_v54 }
 0x273   :  { %1148 = vmatpush.msra.mxu1 %v1089_v60  ;;  %v1216_v60 = vld [vmem:[#allocation6 + $0xc68] sm:$0xff] }
 0x274   :  { %1131 = vmatpush.msra.mxu0 %v1051_v59  ;;  %v1253_v59 = vld [vmem:[#allocation6 + $0xd90] sm:$0xff] }
 0x275   :  { %1149 = vmatpush.msra.mxu1 %v1087_v0  ;;  %v1214_v0 = vld [vmem:[#allocation6 + $0xc58] sm:$0xff] }
 0x276   :  { %1132 = vmatpush.msra.mxu0 %v1049_v63  ;;  %v1251_v63 = vld [vmem:[#allocation6 + $0xd80] sm:$0xff] }
 0x277   :  { %1150 = vmatpush.msra.mxu1 %v1085_v4  ;;  %v1212_v4 = vld [vmem:[#allocation6 + $0xc48] sm:$0xff] }
 0x278   :  { %1133 = vmatpush.msra.mxu0 %v1047_v3  ;;  %v1249_v3 = vld [vmem:[#allocation6 + $0xd70] sm:$0xff] }
 0x279   :  { %1151 = vmatpush.msra.mxu1 %v1083_v7  ;;  %v1247_v7 = vld [vmem:[#allocation6 + $0xd60] sm:$0xff] }
 0x27b   :  { %1152 = vmatpush.msra.mxu1 %v1081_v9  ;;  %v1248_v9 = vld [vmem:[#allocation6 + $0xd68] sm:$0xff] }
 0x27d   :  { %1153 = vmatpush.msra.mxu1 %v1079_v12  ;;  %v1245_v12 = vld [vmem:[#allocation6 + $0xd50] sm:$0xff] }
 0x2d5   :  { %v825_v32 = vpop.f32.mrf.mxu0 }
 0x2d6   :  { %v826_v35 = vadd.f32 %v825_v32, %v804_v29  ;;  %v1259_v29 = vld [vmem:[#allocation6 + $0xdc0] sm:$0xff]  ;;  %v1224_v32 = vld [vmem:[#allocation6 + $0xca8] sm:$0xff] }
 0x2db   :  { %v845_v36 = vpop.f32.mrf.mxu1  ;;  %v865_v39 = vpop.f32.mrf.mxu2 }
 0x2dc   :  { %v846_v37 = vadd.f32 %v845_v36, %v826_v35  ;;  %v866_v42 = vadd.f32 %v865_v39, %v805_v38  ;;  %v1221_v35 = vld [vmem:[#allocation6 + $0xc90] sm:$0xff]  ;;  %v1222_v36 = vld [vmem:[#allocation6 + $0xc98] sm:$0xff]  ;;  %v1256_v38 = vld [vmem:[#allocation6 + $0xda8] sm:$0xff] }
 0x2dd   :  { %v1219_v39 = vld [vmem:[#allocation6 + $0xc80] sm:$0xff] }
 0x2de   :  { %v888_v40 = vadd.f32 %v846_v37, %v2215_v11  ;;  %v1058_v11 = vld [vmem:[#allocation6 + $0xa58] sm:$0xff]  ;;  %v1255_v37 = vld [vmem:[#allocation6 + $0xda0] sm:$0xff] }
 0x2df   :  { %1168 = vmatpush.msra.mxu2 %v1058_v11 }
 0x2e0   :  { %v2225_v41 = vmax.f32 %v888_v40, 0.0  ;;  %v1220_v40 = vld [vmem:[#allocation6 + $0xc88] sm:$0xff] }
 0x2e1   :  { %v885_v43 = vpop.f32.mrf.mxu3  ;;  %1169 = vmatpush.msra.mxu2 %v1056_v52 }
 0x2e2   :  { %v886_v44 = vadd.f32 %v885_v43, %v866_v42  ;;  %980 = vmatmul.f32.vlgmr.msrb.gmra.mxu0 %v2225_v41  ;;  %1020 = vmatmul.f32.vlgmr.msrb.gmra.mxu2 %v2225_v41  ;;  %v958_v42 = vld [vmem:[#allocation7 + $0x4] ss:$8 sm:$0x3]  ;;  %v1217_v43 = vld [vmem:[#allocation6 + $0xc70] sm:$0xff] }
 0x2e3   :  { %1170 = vmatpush.msra.mxu2 %v1054_v57  ;;  %1274 = vmatpush.msrb.mxu0 %v1233_v14  ;;  %v961_v50 = vperm.slane %v958_v42, 1  ;;  %v1246_v14 = vld [vmem:[#allocation6 + $0xd58] sm:$0xff] }
 0x2e4   :  { %v889_v45 = vadd.f32 %v886_v44, %v2220_v16  ;;  %v1094_v16 = vld [vmem:[#allocation6 + $0xb78] sm:$0xff] }
 0x2e5   :  { %1186 = vmatpush.msra.mxu3 %v1094_v16  ;;  %1171 = vmatpush.msra.mxu2 %v1052_v61  ;;  %v1218_v44 = vld [vmem:[#allocation6 + $0xc78] sm:$0xff] }
 0x2e6   :  { %v2230_v46 = vmax.f32 %v889_v45, 0.0  ;;  %1275 = vmatpush.msrb.mxu0 %v1231_v17  ;;  %v960_v45 = vperm.slane %v958_v42, 0  ;;  %v1254_v61 = vld [vmem:[#allocation6 + $0xd98] sm:$0xff]  ;;  %v1243_v17 = vld [vmem:[#allocation6 + $0xd40] sm:$0xff] }
 0x2e7   :  { %1187 = vmatpush.msra.mxu3 %v1092_v58  ;;  %1172 = vmatpush.msra.mxu2 %v1050_v1  ;;  %v1215_v58 = vld [vmem:[#allocation6 + $0xc60] sm:$0xff]  ;;  %v1252_v1 = vld [vmem:[#allocation6 + $0xd88] sm:$0xff]  ;;  %v1416_v42 = vld [vmem:[#allocation6 + $0xfd8] sm:$0xff] }
 0x2e8   :  { %1000 = vmatmul.f32.vlgmr.msrb.gmra.mxu1 %v2230_v46  ;;  %1040 = vmatmul.f32.vlgmr.msrb.gmra.mxu3 %v2230_v46 }
 0x2e9   :  { %1188 = vmatpush.msra.mxu3 %v1090_v62  ;;  %1173 = vmatpush.msra.mxu2 %v1048_v5  ;;  %v1213_v62 = vld [vmem:[#allocation6 + $0xc50] sm:$0xff]  ;;  %v1250_v5 = vld [vmem:[#allocation6 + $0xd78] sm:$0xff] }
 0x2ea   :  { %1294 = vmatpush.msrb.mxu1 %v1265_v20  ;;  %1276 = vmatpush.msrb.mxu0 %v1229_v53  ;;  %v1244_v53 = vld [vmem:[#allocation6 + $0xd48] sm:$0xff]  ;;  %v1241_v20 = vld [vmem:[#allocation6 + $0xd30] sm:$0xff] }
 0x2eb   :  { %1189 = vmatpush.msra.mxu3 %v1088_v2  ;;  %1314 = vmatpush.msrb.mxu2 %v1234_v15  ;;  %v1211_v2 = vld [vmem:[#allocation6 + $0xc40] sm:$0xff]  ;;  %v1205_v15 = vld [vmem:[#allocation6 + $0xc10] sm:$0xff] }
 0x2ec   :  { %1295 = vmatpush.msrb.mxu1 %v1263_v22  ;;  %1277 = vmatpush.msrb.mxu0 %v1227_v56  ;;  %v1242_v22 = vld [vmem:[#allocation6 + $0xd38] sm:$0xff]  ;;  %v1239_v56 = vld [vmem:[#allocation6 + $0xd20] sm:$0xff] }
 0x2ed   :  { %1190 = vmatpush.msra.mxu3 %v1086_v6  ;;  %1315 = vmatpush.msrb.mxu2 %v1232_v18  ;;  %v1209_v6 = vld [vmem:[#allocation6 + $0xc30] sm:$0xff]  ;;  %v1206_v18 = vld [vmem:[#allocation6 + $0xc18] sm:$0xff] }
 0x2ee   :  { %1296 = vmatpush.msrb.mxu1 %v1261_v25  ;;  %1278 = vmatpush.msrb.mxu0 %v1225_v27  ;;  %v1238_v25 = vld [vmem:[#allocation6 + $0xd18] sm:$0xff]  ;;  %v1236_v27 = vld [vmem:[#allocation6 + $0xd08] sm:$0xff] }
 0x2ef   :  { %1191 = vmatpush.msra.mxu3 %v1084_v8  ;;  %1316 = vmatpush.msrb.mxu2 %v1230_v19  ;;  %v1210_v8 = vld [vmem:[#allocation6 + $0xc38] sm:$0xff]  ;;  %v1203_v19 = vld [vmem:[#allocation6 + $0xc00] sm:$0xff] }
 0x2f0   :  { %1297 = vmatpush.msrb.mxu1 %v1259_v29  ;;  %1279 = vmatpush.msrb.mxu0 %v1223_v31  ;;  %v1388_v29 = vld [vmem:[#allocation6 + $0xef8] sm:$0xff]  ;;  %v1386_v31 = vld [vmem:[#allocation6 + $0xee8] sm:$0xff] }
 0x2f1   :  { %1192 = vmatpush.msra.mxu3 %v1082_v10  ;;  %1317 = vmatpush.msrb.mxu2 %v1228_v23  ;;  %v1207_v10 = vld [vmem:[#allocation6 + $0xc20] sm:$0xff]  ;;  %v1240_v23 = vld [vmem:[#allocation6 + $0xd28] sm:$0xff] }
 0x2f2   :  { %1298 = vmatpush.msrb.mxu1 %v1257_v33  ;;  %1280 = vmatpush.msrb.mxu0 %v1221_v35  ;;  %v1384_v33 = vld [vmem:[#allocation6 + $0xed8] sm:$0xff] }
 0x2f3   :  { %1193 = vmatpush.msra.mxu3 %v1080_v13  ;;  %1318 = vmatpush.msrb.mxu2 %v1226_v28  ;;  %v1208_v13 = vld [vmem:[#allocation6 + $0xc28] sm:$0xff]  ;;  %v1387_v28 = vld [vmem:[#allocation6 + $0xef0] sm:$0xff]  ;;  %v1420_v35 = vld [vmem:[#allocation6 + $0xff8] sm:$0xff] }
 0x2f4   :  { %1299 = vmatpush.msrb.mxu1 %v1255_v37  ;;  %1281 = vmatpush.msrb.mxu0 %v1219_v39  ;;  %v1381_v37 = vld [vmem:[#allocation6 + $0xec0] sm:$0xff]  ;;  %v1418_v39 = vld [vmem:[#allocation6 + $0xfe8] sm:$0xff] }
 0x2f5   :  { %1334 = vmatpush.msrb.mxu3 %v1266_v21  ;;  %1319 = vmatpush.msrb.mxu2 %v1224_v32  ;;  %v1204_v21 = vld [vmem:[#allocation6 + $0xc08] sm:$0xff]  ;;  %v1383_v32 = vld [vmem:[#allocation6 + $0xed0] sm:$0xff] }
 0x2f6   :  { %1282 = vmatpush.msrb.mxu0 %v1217_v43  ;;  %1300 = vmatpush.msrb.mxu1 %v1253_v59  ;;  %v1379_v43 = vld [vmem:[#allocation6 + $0xeb0] sm:$0xff] }
 0x2f7   :  { %1335 = vmatpush.msrb.mxu3 %v1264_v24  ;;  %1320 = vmatpush.msrb.mxu2 %v1222_v36  ;;  %v1237_v24 = vld [vmem:[#allocation6 + $0xd10] sm:$0xff]  ;;  %v1417_v36 = vld [vmem:[#allocation6 + $0xfe0] sm:$0xff] }
 0x2f8   :  { %1283 = vmatpush.msrb.mxu0 %v1215_v58  ;;  %1301 = vmatpush.msrb.mxu1 %v1251_v63  ;;  %v1374_v58 = vld [vmem:[#allocation6 + $0xe88] sm:$0xff]  ;;  %v1407_v59 = vld [vmem:[#allocation6 + $0xf90] sm:$0xff]  ;;  %v1372_v63 = vld [vmem:[#allocation6 + $0xe78] sm:$0xff] }
 0x2f9   :  { %1336 = vmatpush.msrb.mxu3 %v1262_v26  ;;  %1321 = vmatpush.msrb.mxu2 %v1220_v40  ;;  %v1235_v26 = vld [vmem:[#allocation6 + $0xd00] sm:$0xff]  ;;  %v1415_v40 = vld [vmem:[#allocation6 + $0xfd0] sm:$0xff] }
 0x2fa   :  { %1284 = vmatpush.msrb.mxu0 %v1213_v62  ;;  %1302 = vmatpush.msrb.mxu1 %v1249_v3  ;;  %v1371_v62 = vld [vmem:[#allocation6 + $0xe70] sm:$0xff] }
 0x2fb   :  { %1337 = vmatpush.msrb.mxu3 %v1260_v30  ;;  %1322 = vmatpush.msrb.mxu2 %v1218_v44  ;;  %v1385_v30 = vld [vmem:[#allocation6 + $0xee0] sm:$0xff]  ;;  %v1380_v44 = vld [vmem:[#allocation6 + $0xeb8] sm:$0xff] }
 0x2fc   :  { %1285 = vmatpush.msrb.mxu0 %v1211_v2  ;;  %1303 = vmatpush.msrb.mxu1 %v1247_v7  ;;  %v1370_v2 = vld [vmem:[#allocation6 + $0xe68] sm:$0xff] }
 0x2fd   :  { %1338 = vmatpush.msrb.mxu3 %v1258_v34  ;;  %1323 = vmatpush.msrb.mxu2 %v1216_v60  ;;  %v1419_v34 = vld [vmem:[#allocation6 + $0xff0] sm:$0xff]  ;;  %v1408_v60 = vld [vmem:[#allocation6 + $0xf98] sm:$0xff] }
 0x2fe   :  { %1286 = vmatpush.msrb.mxu0 %v1209_v6  ;;  %1304 = vmatpush.msrb.mxu1 %v1245_v12 }
 0x2ff   :  { %1339 = vmatpush.msrb.mxu3 %v1256_v38  ;;  %1324 = vmatpush.msrb.mxu2 %v1214_v0  ;;  %v1382_v38 = vld [vmem:[#allocation6 + $0xec8] sm:$0xff] }
 0x300   :  { %1287 = vmatpush.msrb.mxu0 %v1207_v10  ;;  %1305 = vmatpush.msrb.mxu1 %v1243_v17  ;;  %v1367_v17 = vld [vmem:[#allocation6 + $0xe50] sm:$0xff] }
 0x301   :  { %1340 = vmatpush.msrb.mxu3 %v1254_v61  ;;  %1325 = vmatpush.msrb.mxu2 %v1212_v4 }
 0x302   :  { %1288 = vmatpush.msrb.mxu0 %v1205_v15  ;;  %1306 = vmatpush.msrb.mxu1 %v1241_v20  ;;  %v1403_v20 = vld [vmem:[#allocation6 + $0xf70] sm:$0xff] }
 0x303   :  { %1341 = vmatpush.msrb.mxu3 %v1252_v1  ;;  %1326 = vmatpush.msrb.mxu2 %v1210_v8  ;;  %v1369_v1 = vld [vmem:[#allocation6 + $0xe60] sm:$0xff] }
 0x304   :  { %1289 = vmatpush.msrb.mxu0 %v1203_v19  ;;  %1307 = vmatpush.msrb.mxu1 %v1239_v56  ;;  %v1365_v19 = vld [vmem:[#allocation6 + $0xe40] sm:$0xff] }
 0x305   :  { %1342 = vmatpush.msrb.mxu3 %v1250_v5  ;;  %1327 = vmatpush.msrb.mxu2 %v1208_v13  ;;  %v1401_v56 = vld [vmem:[#allocation6 + $0xf60] sm:$0xff] }
 0x306   :  { %1308 = vmatpush.msrb.mxu1 %v1237_v24  ;;  %v1402_v24 = vld [vmem:[#allocation6 + $0xf68] sm:$0xff] }
 0x307   :  { %1343 = vmatpush.msrb.mxu3 %v1248_v9  ;;  %1328 = vmatpush.msrb.mxu2 %v1206_v18  ;;  %v1405_v18 = vld [vmem:[#allocation6 + $0xf80] sm:$0xff] }
 0x308   :  { %1309 = vmatpush.msrb.mxu1 %v1235_v26  ;;  %v1399_v26 = vld [vmem:[#allocation6 + $0xf50] sm:$0xff] }
 0x309   :  { %1344 = vmatpush.msrb.mxu3 %v1246_v14  ;;  %1329 = vmatpush.msrb.mxu2 %v1204_v21  ;;  %v1366_v21 = vld [vmem:[#allocation6 + $0xe48] sm:$0xff] }
 0x30b   :  { %1345 = vmatpush.msrb.mxu3 %v1244_v53  ;;  %v1406_v53 = vld [vmem:[#allocation6 + $0xf88] sm:$0xff] }
 0x30d   :  { %1346 = vmatpush.msrb.mxu3 %v1242_v22  ;;  %v1363_v22 = vld [vmem:[#allocation6 + $0xe30] sm:$0xff] }
 0x30f   :  { %1347 = vmatpush.msrb.mxu3 %v1240_v23  ;;  %v1364_v23 = vld [vmem:[#allocation6 + $0xe38] sm:$0xff] }
 0x311   :  { %1348 = vmatpush.msrb.mxu3 %v1238_v25  ;;  %v1361_v25 = vld [vmem:[#allocation6 + $0xe20] sm:$0xff] }
 0x313   :  { %1349 = vmatpush.msrb.mxu3 %v1236_v27  ;;  %v1362_v27 = vld [vmem:[#allocation6 + $0xe28] sm:$0xff] }
 0x35f   :  { %v981_v47 = vpop.f32.mrf.mxu0 }
 0x360   :  { %v982_v48 = vadd.f32 %v981_v47, %v960_v45  ;;  %v1413_v45 = vld [vmem:[#allocation6 + $0xfc0] sm:$0xff]  ;;  %v1414_v47 = vld [vmem:[#allocation6 + $0xfc8] sm:$0xff] }
 0x365   :  { %v1001_v11 = vpop.f32.mrf.mxu1  ;;  %v1021_v51 = vpop.f32.mrf.mxu2 }
 0x366   :  { %v1002_v49 = vadd.f32 %v1001_v11, %v982_v48  ;;  %v1022_v16 = vadd.f32 %v1021_v51, %v961_v50  ;;  %v1377_v48 = vld [vmem:[#allocation6 + $0xea0] sm:$0xff]  ;;  %v1378_v11 = vld [vmem:[#allocation6 + $0xea8] sm:$0xff]  ;;  %v1412_v50 = vld [vmem:[#allocation6 + $0xfb8] sm:$0xff] }
 0x367   :  { %v1375_v51 = vld [vmem:[#allocation6 + $0xe90] sm:$0xff] }
 0x368   :  { %v1044_v52 = vmax.f32 %v1002_v49, 0.0  ;;  %v1411_v49 = vld [vmem:[#allocation6 + $0xfb0] sm:$0xff] }
 0x36a   :  { %1134 = vmatmul.f32.vlgmr.msra.gmra.mxu0 %v1044_v52  ;;  %1174 = vmatmul.f32.vlgmr.msra.gmra.mxu2 %v1044_v52  ;;  %v1376_v52 = vld [vmem:[#allocation6 + $0xe98] sm:$0xff] }
 0x36b   :  { %v1041_v54 = vpop.f32.mrf.mxu3  ;;  %1428 = vmatpush.msra.mxu0 %v1387_v28  ;;  %1468 = vmatpush.msra.mxu2 %v1388_v29  ;;  %v1400_v28 = vld [vmem:[#allocation6 + $0xf58] sm:$0xff]  ;;  %v1359_v29 = vld [vmem:[#allocation6 + $0xe10] sm:$0xff] }
 0x36c   :  { %v1042_v55 = vadd.f32 %v1041_v54, %v1022_v16  ;;  %v1112_v16 = vld [vmem:[#allocation7 + $0x5] ss:$8 sm:$0x3] }
 0x36d   :  { %1429 = vmatpush.msra.mxu0 %v1385_v30  ;;  %1469 = vmatpush.msra.mxu2 %v1386_v31  ;;  %v1409_v54 = vld [vmem:[#allocation6 + $0xfa0] sm:$0xff]  ;;  %v1114_v61 = vperm.slane %v1112_v16, 0  ;;  %v1115_v6 = vperm.slane %v1112_v16, 1  ;;  %v1360_v31 = vld [vmem:[#allocation6 + $0xe18] sm:$0xff] }
 0x36e   :  { %v1045_v57 = vmax.f32 %v1042_v55, 0.0  ;;  %v1410_v55 = vld [vmem:[#allocation6 + $0xfa8] sm:$0xff]  ;;  %v1397_v30 = vld [vmem:[#allocation6 + $0xf40] sm:$0xff] }
 0x36f   :  { %1430 = vmatpush.msra.mxu0 %v1383_v32  ;;  %1470 = vmatpush.msra.mxu2 %v1384_v33  ;;  %v1398_v32 = vld [vmem:[#allocation6 + $0xf48] sm:$0xff]  ;;  %v1357_v33 = vld [vmem:[#allocation6 + $0xe00] sm:$0xff] }
 0x370   :  { %1154 = vmatmul.f32.vlgmr.msra.gmra.mxu1 %v1045_v57  ;;  %1194 = vmatmul.f32.vlgmr.msra.gmra.mxu3 %v1045_v57  ;;  %v1373_v57 = vld [vmem:[#allocation6 + $0xe80] sm:$0xff] }
 0x371   :  { %1448 = vmatpush.msra.mxu1 %v1419_v34  ;;  %1488 = vmatpush.msra.mxu3 %v1420_v35  ;;  %v1395_v34 = vld [vmem:[#allocation6 + $0xf30] sm:$0xff]  ;;  %v1358_v35 = vld [vmem:[#allocation6 + $0xe08] sm:$0xff]  ;;  %v1537_v16 = vld [vmem:[#allocation6 + $0x10c0] sm:$0xff] }
 0x372   :  { %1431 = vmatpush.msra.mxu0 %v1381_v37  ;;  %1471 = vmatpush.msra.mxu2 %v1382_v38  ;;  %v1393_v37 = vld [vmem:[#allocation6 + $0xf20] sm:$0xff]  ;;  %v1394_v38 = vld [vmem:[#allocation6 + $0xf28] sm:$0xff] }
 0x373   :  { %1449 = vmatpush.msra.mxu1 %v1417_v36  ;;  %1489 = vmatpush.msra.mxu3 %v1418_v39  ;;  %v1396_v36 = vld [vmem:[#allocation6 + $0xf38] sm:$0xff]  ;;  %v1391_v39 = vld [vmem:[#allocation6 + $0xf10] sm:$0xff] }
 0x374   :  { %1432 = vmatpush.msra.mxu0 %v1379_v43  ;;  %1472 = vmatpush.msra.mxu2 %v1380_v44  ;;  %v1390_v43 = vld [vmem:[#allocation6 + $0xf08] sm:$0xff]  ;;  %v1543_v44 = vld [vmem:[#allocation6 + $0x10f0] sm:$0xff] }
 0x375   :  { %1450 = vmatpush.msra.mxu1 %v1415_v40  ;;  %1490 = vmatpush.msra.mxu3 %v1416_v42  ;;  %v1392_v40 = vld [vmem:[#allocation6 + $0xf18] sm:$0xff]  ;;  %v1389_v42 = vld [vmem:[#allocation6 + $0xf00] sm:$0xff] }
 0x376   :  { %1433 = vmatpush.msra.mxu0 %v1377_v48  ;;  %1473 = vmatpush.msra.mxu2 %v1378_v11  ;;  %v1542_v48 = vld [vmem:[#allocation6 + $0x10e8] sm:$0xff]  ;;  %v1539_v11 = vld [vmem:[#allocation6 + $0x10d0] sm:$0xff] }
 0x377   :  { %1451 = vmatpush.msra.mxu1 %v1413_v45  ;;  %1491 = vmatpush.msra.mxu3 %v1414_v47  ;;  %v1544_v45 = vld [vmem:[#allocation6 + $0x10f8] sm:$0xff]  ;;  %v1541_v47 = vld [vmem:[#allocation6 + $0x10e0] sm:$0xff] }
 0x378   :  { %1434 = vmatpush.msra.mxu0 %v1375_v51  ;;  %1474 = vmatpush.msra.mxu2 %v1376_v52  ;;  %v1576_v51 = vld [vmem:[#allocation6 + $0x11f8] sm:$0xff]  ;;  %v1573_v52 = vld [vmem:[#allocation6 + $0x11e0] sm:$0xff] }
 0x379   :  { %1452 = vmatpush.msra.mxu1 %v1411_v49  ;;  %1492 = vmatpush.msra.mxu3 %v1412_v50  ;;  %v1540_v49 = vld [vmem:[#allocation6 + $0x10d8] sm:$0xff]  ;;  %v1575_v50 = vld [vmem:[#allocation6 + $0x11f0] sm:$0xff] }
 0x37a   :  { %1435 = vmatpush.msra.mxu0 %v1373_v57  ;;  %1475 = vmatpush.msra.mxu2 %v1374_v58  ;;  %v1571_v57 = vld [vmem:[#allocation6 + $0x11d0] sm:$0xff]  ;;  %v1572_v58 = vld [vmem:[#allocation6 + $0x11d8] sm:$0xff] }
 0x37b   :  { %1453 = vmatpush.msra.mxu1 %v1409_v54  ;;  %1493 = vmatpush.msra.mxu3 %v1410_v55  ;;  %v1538_v54 = vld [vmem:[#allocation6 + $0x10c8] sm:$0xff] }
 0x37c   :  { %1436 = vmatpush.msra.mxu0 %v1371_v62  ;;  %1476 = vmatpush.msra.mxu2 %v1372_v63  ;;  %v1574_v55 = vld [vmem:[#allocation6 + $0x11e8] sm:$0xff]  ;;  %v1533_v63 = vld [vmem:[#allocation6 + $0x10a0] sm:$0xff] }
 0x37d   :  { %1454 = vmatpush.msra.mxu1 %v1407_v59  ;;  %1494 = vmatpush.msra.mxu3 %v1408_v60  ;;  %v1535_v59 = vld [vmem:[#allocation6 + $0x10b0] sm:$0xff]  ;;  %v1536_v60 = vld [vmem:[#allocation6 + $0x10b8] sm:$0xff]  ;;  %v1570_v62 = vld [vmem:[#allocation6 + $0x11c8] sm:$0xff] }
 0x37e   :  { %1437 = vmatpush.msra.mxu0 %v1369_v1  ;;  %1477 = vmatpush.msra.mxu2 %v1370_v2  ;;  %v1567_v1 = vld [vmem:[#allocation6 + $0x11b0] sm:$0xff]  ;;  %v1568_v2 = vld [vmem:[#allocation6 + $0x11b8] sm:$0xff] }
 0x37f   :  { %1455 = vmatpush.msra.mxu1 %v1405_v18  ;;  %1495 = vmatpush.msra.mxu3 %v1406_v53 }
 0x380   :  { %1438 = vmatpush.msra.mxu0 %v1367_v17 }
 0x381   :  { %1456 = vmatpush.msra.mxu1 %v1403_v20 }
 0x382   :  { %1439 = vmatpush.msra.mxu0 %v1365_v19 }
 0x383   :  { %1457 = vmatpush.msra.mxu1 %v1401_v56 }
 0x384   :  { %1440 = vmatpush.msra.mxu0 %v1363_v22 }
 0x385   :  { %1458 = vmatpush.msra.mxu1 %v1399_v26  ;;  %v1526_v26 = vld [vmem:[#allocation6 + $0x1068] sm:$0xff] }
 0x386   :  { %1441 = vmatpush.msra.mxu0 %v1361_v25  ;;  %v1563_v25 = vld [vmem:[#allocation6 + $0x1190] sm:$0xff] }
 0x387   :  { %1459 = vmatpush.msra.mxu1 %v1397_v30  ;;  %v1524_v30 = vld [vmem:[#allocation6 + $0x1058] sm:$0xff] }
 0x388   :  { %1442 = vmatpush.msra.mxu0 %v1359_v29  ;;  %v1561_v29 = vld [vmem:[#allocation6 + $0x1180] sm:$0xff] }
 0x389   :  { %1460 = vmatpush.msra.mxu1 %v1395_v34  ;;  %v1522_v34 = vld [vmem:[#allocation6 + $0x1048] sm:$0xff] }
 0x38a   :  { %1443 = vmatpush.msra.mxu0 %v1357_v33  ;;  %v1559_v33 = vld [vmem:[#allocation6 + $0x1170] sm:$0xff] }
 0x38b   :  { %1461 = vmatpush.msra.mxu1 %v1393_v37  ;;  %v1557_v37 = vld [vmem:[#allocation6 + $0x1160] sm:$0xff] }
 0x38d   :  { %1462 = vmatpush.msra.mxu1 %v1391_v39  ;;  %v1558_v39 = vld [vmem:[#allocation6 + $0x1168] sm:$0xff] }
 0x38f   :  { %1463 = vmatpush.msra.mxu1 %v1389_v42  ;;  %v1555_v42 = vld [vmem:[#allocation6 + $0x1150] sm:$0xff] }
 0x3e7   :  { %v1135_v0 = vpop.f32.mrf.mxu0 }
 0x3e8   :  { %v1136_v3 = vadd.f32 %v1135_v0, %v1114_v61  ;;  %v1569_v61 = vld [vmem:[#allocation6 + $0x11c0] sm:$0xff]  ;;  %v1534_v0 = vld [vmem:[#allocation6 + $0x10a8] sm:$0xff] }
 0x3ed   :  { %v1155_v4 = vpop.f32.mrf.mxu1  ;;  %v1175_v7 = vpop.f32.mrf.mxu2 }
 0x3ee   :  { %v1156_v5 = vadd.f32 %v1155_v4, %v1136_v3  ;;  %v1176_v10 = vadd.f32 %v1175_v7, %v1115_v6  ;;  %v1531_v3 = vld [vmem:[#allocation6 + $0x1090] sm:$0xff]  ;;  %v1532_v4 = vld [vmem:[#allocation6 + $0x1098] sm:$0xff]  ;;  %v1566_v6 = vld [vmem:[#allocation6 + $0x11a8] sm:$0xff] }
 0x3ef   :  { %v1529_v7 = vld [vmem:[#allocation6 + $0x1080] sm:$0xff] }
 0x3f0   :  { %v1198_v8 = vadd.f32 %v1156_v5, %v2225_v41  ;;  %v1368_v41 = vld [vmem:[#allocation6 + $0xe58] sm:$0xff]  ;;  %v1565_v5 = vld [vmem:[#allocation6 + $0x11a0] sm:$0xff] }
 0x3f1   :  { %1478 = vmatpush.msra.mxu2 %v1368_v41 }
 0x3f2   :  { %v2235_v9 = vmax.f32 %v1198_v8, 0.0  ;;  %v1530_v8 = vld [vmem:[#allocation6 + $0x1088] sm:$0xff] }
 0x3f3   :  { %v1195_v12 = vpop.f32.mrf.mxu3  ;;  %1479 = vmatpush.msra.mxu2 %v1366_v21 }
 0x3f4   :  { %v1196_v13 = vadd.f32 %v1195_v12, %v1176_v10  ;;  %1290 = vmatmul.f32.vlgmr.msrb.gmra.mxu0 %v2235_v9  ;;  %1330 = vmatmul.f32.vlgmr.msrb.gmra.mxu2 %v2235_v9  ;;  %v1268_v10 = vld [vmem:[#allocation7 + $0x6] ss:$8 sm:$0x3]  ;;  %v1527_v12 = vld [vmem:[#allocation6 + $0x1070] sm:$0xff] }
 0x3f5   :  { %1480 = vmatpush.msra.mxu2 %v1364_v23  ;;  %1584 = vmatpush.msrb.mxu0 %v1543_v44  ;;  %v1271_v19 = vperm.slane %v1268_v10, 1  ;;  %v1556_v44 = vld [vmem:[#allocation6 + $0x1158] sm:$0xff] }
 0x3f6   :  { %v1199_v14 = vadd.f32 %v1196_v13, %v2230_v46  ;;  %v1404_v46 = vld [vmem:[#allocation6 + $0xf78] sm:$0xff] }
 0x3f7   :  { %1496 = vmatpush.msra.mxu3 %v1404_v46  ;;  %1481 = vmatpush.msra.mxu2 %v1362_v27  ;;  %v1528_v13 = vld [vmem:[#allocation6 + $0x1078] sm:$0xff] }
 0x3f8   :  { %v2240_v15 = vmax.f32 %v1199_v14, 0.0  ;;  %1585 = vmatpush.msrb.mxu0 %v1541_v47  ;;  %v1270_v14 = vperm.slane %v1268_v10, 0  ;;  %v1564_v27 = vld [vmem:[#allocation6 + $0x1198] sm:$0xff]  ;;  %v1553_v47 = vld [vmem:[#allocation6 + $0x1140] sm:$0xff] }
 0x3f9   :  { %1497 = vmatpush.msra.mxu3 %v1402_v24  ;;  %1482 = vmatpush.msra.mxu2 %v1360_v31  ;;  %v1525_v24 = vld [vmem:[#allocation6 + $0x1060] sm:$0xff]  ;;  %v1562_v31 = vld [vmem:[#allocation6 + $0x1188] sm:$0xff]  ;;  %v1726_v10 = vld [vmem:[#allocation6 + $0x13d8] sm:$0xff] }
 0x3fa   :  { %1310 = vmatmul.f32.vlgmr.msrb.gmra.mxu1 %v2240_v15  ;;  %1350 = vmatmul.f32.vlgmr.msrb.gmra.mxu3 %v2240_v15 }
 0x3fb   :  { %1498 = vmatpush.msra.mxu3 %v1400_v28  ;;  %1483 = vmatpush.msra.mxu2 %v1358_v35  ;;  %v1523_v28 = vld [vmem:[#allocation6 + $0x1050] sm:$0xff]  ;;  %v1560_v35 = vld [vmem:[#allocation6 + $0x1178] sm:$0xff] }
 0x3fc   :  { %1604 = vmatpush.msrb.mxu1 %v1575_v50  ;;  %1586 = vmatpush.msrb.mxu0 %v1539_v11  ;;  %v1554_v11 = vld [vmem:[#allocation6 + $0x1148] sm:$0xff]  ;;  %v1551_v50 = vld [vmem:[#allocation6 + $0x1130] sm:$0xff] }
 0x3fd   :  { %1499 = vmatpush.msra.mxu3 %v1398_v32  ;;  %1624 = vmatpush.msrb.mxu2 %v1544_v45  ;;  %v1521_v32 = vld [vmem:[#allocation6 + $0x1040] sm:$0xff]  ;;  %v1515_v45 = vld [vmem:[#allocation6 + $0x1010] sm:$0xff] }
 0x3fe   :  { %1605 = vmatpush.msrb.mxu1 %v1573_v52  ;;  %1587 = vmatpush.msrb.mxu0 %v1537_v16  ;;  %v1552_v52 = vld [vmem:[#allocation6 + $0x1138] sm:$0xff]  ;;  %v1549_v16 = vld [vmem:[#allocation6 + $0x1120] sm:$0xff] }
 0x3ff   :  { %1500 = vmatpush.msra.mxu3 %v1396_v36  ;;  %1625 = vmatpush.msrb.mxu2 %v1542_v48  ;;  %v1519_v36 = vld [vmem:[#allocation6 + $0x1030] sm:$0xff]  ;;  %v1516_v48 = vld [vmem:[#allocation6 + $0x1018] sm:$0xff] }
 0x400   :  { %1606 = vmatpush.msrb.mxu1 %v1571_v57  ;;  %1588 = vmatpush.msrb.mxu0 %v1535_v59  ;;  %v1548_v57 = vld [vmem:[#allocation6 + $0x1118] sm:$0xff]  ;;  %v1546_v59 = vld [vmem:[#allocation6 + $0x1108] sm:$0xff] }
 0x401   :  { %1501 = vmatpush.msra.mxu3 %v1394_v38  ;;  %1626 = vmatpush.msrb.mxu2 %v1540_v49  ;;  %v1520_v38 = vld [vmem:[#allocation6 + $0x1038] sm:$0xff]  ;;  %v1513_v49 = vld [vmem:[#allocation6 + $0x1000] sm:$0xff] }
 0x402   :  { %1607 = vmatpush.msrb.mxu1 %v1569_v61  ;;  %1589 = vmatpush.msrb.mxu0 %v1533_v63  ;;  %v1698_v61 = vld [vmem:[#allocation6 + $0x12f8] sm:$0xff]  ;;  %v1696_v63 = vld [vmem:[#allocation6 + $0x12e8] sm:$0xff] }
 0x403   :  { %1502 = vmatpush.msra.mxu3 %v1392_v40  ;;  %1627 = vmatpush.msrb.mxu2 %v1538_v54  ;;  %v1517_v40 = vld [vmem:[#allocation6 + $0x1020] sm:$0xff]  ;;  %v1550_v54 = vld [vmem:[#allocation6 + $0x1128] sm:$0xff] }
 0x404   :  { %1608 = vmatpush.msrb.mxu1 %v1567_v1  ;;  %1590 = vmatpush.msrb.mxu0 %v1531_v3  ;;  %v1694_v1 = vld [vmem:[#allocation6 + $0x12d8] sm:$0xff] }
 0x405   :  { %1503 = vmatpush.msra.mxu3 %v1390_v43  ;;  %1628 = vmatpush.msrb.mxu2 %v1536_v60  ;;  %v1518_v43 = vld [vmem:[#allocation6 + $0x1028] sm:$0xff]  ;;  %v1697_v60 = vld [vmem:[#allocation6 + $0x12f0] sm:$0xff]  ;;  %v1730_v3 = vld [vmem:[#allocation6 + $0x13f8] sm:$0xff] }
 0x406   :  { %1609 = vmatpush.msrb.mxu1 %v1565_v5  ;;  %1591 = vmatpush.msrb.mxu0 %v1529_v7  ;;  %v1691_v5 = vld [vmem:[#allocation6 + $0x12c0] sm:$0xff]  ;;  %v1728_v7 = vld [vmem:[#allocation6 + $0x13e8] sm:$0xff] }
 0x407   :  { %1644 = vmatpush.msrb.mxu3 %v1576_v51  ;;  %1629 = vmatpush.msrb.mxu2 %v1534_v0  ;;  %v1514_v51 = vld [vmem:[#allocation6 + $0x1008] sm:$0xff]  ;;  %v1693_v0 = vld [vmem:[#allocation6 + $0x12d0] sm:$0xff] }
 0x408   :  { %1592 = vmatpush.msrb.mxu0 %v1527_v12  ;;  %1610 = vmatpush.msrb.mxu1 %v1563_v25  ;;  %v1689_v12 = vld [vmem:[#allocation6 + $0x12b0] sm:$0xff] }
 0x409   :  { %1645 = vmatpush.msrb.mxu3 %v1574_v55  ;;  %1630 = vmatpush.msrb.mxu2 %v1532_v4  ;;  %v1547_v55 = vld [vmem:[#allocation6 + $0x1110] sm:$0xff]  ;;  %v1727_v4 = vld [vmem:[#allocation6 + $0x13e0] sm:$0xff] }
 0x40a   :  { %1593 = vmatpush.msrb.mxu0 %v1525_v24  ;;  %1611 = vmatpush.msrb.mxu1 %v1561_v29  ;;  %v1684_v24 = vld [vmem:[#allocation6 + $0x1288] sm:$0xff]  ;;  %v1717_v25 = vld [vmem:[#allocation6 + $0x1390] sm:$0xff]  ;;  %v1682_v29 = vld [vmem:[#allocation6 + $0x1278] sm:$0xff] }
 0x40b   :  { %1646 = vmatpush.msrb.mxu3 %v1572_v58  ;;  %1631 = vmatpush.msrb.mxu2 %v1530_v8  ;;  %v1545_v58 = vld [vmem:[#allocation6 + $0x1100] sm:$0xff]  ;;  %v1725_v8 = vld [vmem:[#allocation6 + $0x13d0] sm:$0xff] }
 0x40c   :  { %1594 = vmatpush.msrb.mxu0 %v1523_v28  ;;  %1612 = vmatpush.msrb.mxu1 %v1559_v33  ;;  %v1681_v28 = vld [vmem:[#allocation6 + $0x1270] sm:$0xff] }
 0x40d   :  { %1647 = vmatpush.msrb.mxu3 %v1570_v62  ;;  %1632 = vmatpush.msrb.mxu2 %v1528_v13  ;;  %v1695_v62 = vld [vmem:[#allocation6 + $0x12e0] sm:$0xff]  ;;  %v1690_v13 = vld [vmem:[#allocation6 + $0x12b8] sm:$0xff] }
 0x40e   :  { %1595 = vmatpush.msrb.mxu0 %v1521_v32  ;;  %1613 = vmatpush.msrb.mxu1 %v1557_v37  ;;  %v1680_v32 = vld [vmem:[#allocation6 + $0x1268] sm:$0xff] }
 0x40f   :  { %1648 = vmatpush.msrb.mxu3 %v1568_v2  ;;  %1633 = vmatpush.msrb.mxu2 %v1526_v26  ;;  %v1729_v2 = vld [vmem:[#allocation6 + $0x13f0] sm:$0xff]  ;;  %v1718_v26 = vld [vmem:[#allocation6 + $0x1398] sm:$0xff] }
 0x410   :  { %1596 = vmatpush.msrb.mxu0 %v1519_v36  ;;  %1614 = vmatpush.msrb.mxu1 %v1555_v42 }
 0x411   :  { %1649 = vmatpush.msrb.mxu3 %v1566_v6  ;;  %1634 = vmatpush.msrb.mxu2 %v1524_v30  ;;  %v1692_v6 = vld [vmem:[#allocation6 + $0x12c8] sm:$0xff] }
 0x412   :  { %1597 = vmatpush.msrb.mxu0 %v1517_v40  ;;  %1615 = vmatpush.msrb.mxu1 %v1553_v47  ;;  %v1677_v47 = vld [vmem:[#allocation6 + $0x1250] sm:$0xff] }
 0x413   :  { %1650 = vmatpush.msrb.mxu3 %v1564_v27  ;;  %1635 = vmatpush.msrb.mxu2 %v1522_v34 }
 0x414   :  { %1598 = vmatpush.msrb.mxu0 %v1515_v45  ;;  %1616 = vmatpush.msrb.mxu1 %v1551_v50  ;;  %v1713_v50 = vld [vmem:[#allocation6 + $0x1370] sm:$0xff] }
 0x415   :  { %1651 = vmatpush.msrb.mxu3 %v1562_v31  ;;  %1636 = vmatpush.msrb.mxu2 %v1520_v38  ;;  %v1679_v31 = vld [vmem:[#allocation6 + $0x1260] sm:$0xff] }
 0x416   :  { %1599 = vmatpush.msrb.mxu0 %v1513_v49  ;;  %1617 = vmatpush.msrb.mxu1 %v1549_v16  ;;  %v1675_v49 = vld [vmem:[#allocation6 + $0x1240] sm:$0xff] }
 0x417   :  { %1652 = vmatpush.msrb.mxu3 %v1560_v35  ;;  %1637 = vmatpush.msrb.mxu2 %v1518_v43  ;;  %v1711_v16 = vld [vmem:[#allocation6 + $0x1360] sm:$0xff] }
 0x418   :  { %1618 = vmatpush.msrb.mxu1 %v1547_v55  ;;  %v1712_v55 = vld [vmem:[#allocation6 + $0x1368] sm:$0xff] }
 0x419   :  { %1653 = vmatpush.msrb.mxu3 %v1558_v39  ;;  %1638 = vmatpush.msrb.mxu2 %v1516_v48  ;;  %v1715_v48 = vld [vmem:[#allocation6 + $0x1380] sm:$0xff] }
 0x41a   :  { %1619 = vmatpush.msrb.mxu1 %v1545_v58  ;;  %v1709_v58 = vld [vmem:[#allocation6 + $0x1350] sm:$0xff] }
 0x41b   :  { %1654 = vmatpush.msrb.mxu3 %v1556_v44  ;;  %1639 = vmatpush.msrb.mxu2 %v1514_v51  ;;  %v1676_v51 = vld [vmem:[#allocation6 + $0x1248] sm:$0xff] }
 0x41d   :  { %1655 = vmatpush.msrb.mxu3 %v1554_v11  ;;  %v1716_v11 = vld [vmem:[#allocation6 + $0x1388] sm:$0xff] }
 0x41f   :  { %1656 = vmatpush.msrb.mxu3 %v1552_v52  ;;  %v1673_v52 = vld [vmem:[#allocation6 + $0x1230] sm:$0xff] }
 0x421   :  { %1657 = vmatpush.msrb.mxu3 %v1550_v54  ;;  %v1674_v54 = vld [vmem:[#allocation6 + $0x1238] sm:$0xff] }
 0x423   :  { %1658 = vmatpush.msrb.mxu3 %v1548_v57  ;;  %v1671_v57 = vld [vmem:[#allocation6 + $0x1220] sm:$0xff] }
 0x425   :  { %1659 = vmatpush.msrb.mxu3 %v1546_v59  ;;  %v1672_v59 = vld [vmem:[#allocation6 + $0x1228] sm:$0xff] }
 0x471   :  { %v1291_v17 = vpop.f32.mrf.mxu0 }
 0x472   :  { %v1292_v18 = vadd.f32 %v1291_v17, %v1270_v14  ;;  %v1723_v14 = vld [vmem:[#allocation6 + $0x13c0] sm:$0xff]  ;;  %v1724_v17 = vld [vmem:[#allocation6 + $0x13c8] sm:$0xff] }
 0x477   :  { %v1311_v41 = vpop.f32.mrf.mxu1  ;;  %v1331_v20 = vpop.f32.mrf.mxu2 }
 0x478   :  { %v1312_v53 = vadd.f32 %v1311_v41, %v1292_v18  ;;  %v1332_v46 = vadd.f32 %v1331_v20, %v1271_v19  ;;  %v1687_v18 = vld [vmem:[#allocation6 + $0x12a0] sm:$0xff]  ;;  %v1688_v41 = vld [vmem:[#allocation6 + $0x12a8] sm:$0xff]  ;;  %v1722_v19 = vld [vmem:[#allocation6 + $0x13b8] sm:$0xff] }
 0x479   :  { %v1685_v20 = vld [vmem:[#allocation6 + $0x1290] sm:$0xff] }
 0x47a   :  { %v1354_v21 = vmax.f32 %v1312_v53, 0.0  ;;  %v1721_v53 = vld [vmem:[#allocation6 + $0x13b0] sm:$0xff] }
 0x47c   :  { %1444 = vmatmul.f32.vlgmr.msra.gmra.mxu0 %v1354_v21  ;;  %1484 = vmatmul.f32.vlgmr.msra.gmra.mxu2 %v1354_v21  ;;  %v1686_v21 = vld [vmem:[#allocation6 + $0x1298] sm:$0xff] }
 0x47d   :  { %v1351_v22 = vpop.f32.mrf.mxu3  ;;  %1738 = vmatpush.msra.mxu0 %v1697_v60  ;;  %1778 = vmatpush.msra.mxu2 %v1698_v61  ;;  %v1710_v60 = vld [vmem:[#allocation6 + $0x1358] sm:$0xff]  ;;  %v1669_v61 = vld [vmem:[#allocation6 + $0x1210] sm:$0xff] }
 0x47e   :  { %v1352_v56 = vadd.f32 %v1351_v22, %v1332_v46  ;;  %v1422_v46 = vld [vmem:[#allocation7 + $0x7] ss:$8 sm:$0x3] }
 0x47f   :  { %1739 = vmatpush.msra.mxu0 %v1695_v62  ;;  %1779 = vmatpush.msra.mxu2 %v1696_v63  ;;  %v1719_v22 = vld [vmem:[#allocation6 + $0x13a0] sm:$0xff]  ;;  %v1424_v27 = vperm.slane %v1422_v46, 0  ;;  %v1425_v36 = vperm.slane %v1422_v46, 1  ;;  %v1670_v63 = vld [vmem:[#allocation6 + $0x1218] sm:$0xff] }
 0x480   :  { %v1355_v23 = vmax.f32 %v1352_v56, 0.0  ;;  %v1720_v56 = vld [vmem:[#allocation6 + $0x13a8] sm:$0xff]  ;;  %v1707_v62 = vld [vmem:[#allocation6 + $0x1340] sm:$0xff]  ;;  %v1849_v46 = vld [vmem:[%s2387_s5 + $0xd8] sm:$0xff] }
 0x481   :  { %1740 = vmatpush.msra.mxu0 %v1693_v0  ;;  %1780 = vmatpush.msra.mxu2 %v1694_v1  ;;  %v1708_v0 = vld [vmem:[#allocation6 + $0x1348] sm:$0xff]  ;;  %v1667_v1 = vld [vmem:[#allocation6 + $0x1200] sm:$0xff] }
 0x482   :  { %1464 = vmatmul.f32.vlgmr.msra.gmra.mxu1 %v1355_v23  ;;  %1504 = vmatmul.f32.vlgmr.msra.gmra.mxu3 %v1355_v23  ;;  %v1683_v23 = vld [vmem:[#allocation6 + $0x1280] sm:$0xff] }
 0x483   :  { %1758 = vmatpush.msra.mxu1 %v1729_v2  ;;  %1798 = vmatpush.msra.mxu3 %v1730_v3  ;;  %v1705_v2 = vld [vmem:[#allocation6 + $0x1330] sm:$0xff]  ;;  %v1668_v3 = vld [vmem:[#allocation6 + $0x1208] sm:$0xff] }
 0x484   :  { %1741 = vmatpush.msra.mxu0 %v1691_v5  ;;  %1781 = vmatpush.msra.mxu2 %v1692_v6  ;;  %v1703_v5 = vld [vmem:[#allocation6 + $0x1320] sm:$0xff]  ;;  %v1704_v6 = vld [vmem:[#allocation6 + $0x1328] sm:$0xff] }
 0x485   :  { %1759 = vmatpush.msra.mxu1 %v1727_v4  ;;  %1799 = vmatpush.msra.mxu3 %v1728_v7  ;;  %v1706_v4 = vld [vmem:[#allocation6 + $0x1338] sm:$0xff]  ;;  %v1701_v7 = vld [vmem:[#allocation6 + $0x1310] sm:$0xff] }
 0x486   :  { %1742 = vmatpush.msra.mxu0 %v1689_v12  ;;  %1782 = vmatpush.msra.mxu2 %v1690_v13  ;;  %v1700_v12 = vld [vmem:[#allocation6 + $0x1308] sm:$0xff]  ;;  %v1837_v13 = vld [vmem:[%s2387_s5 + $0x78] sm:$0xff] }
 0x487   :  { %1760 = vmatpush.msra.mxu1 %v1725_v8  ;;  %1800 = vmatpush.msra.mxu3 %v1726_v10  ;;  %v1702_v8 = vld [vmem:[#allocation6 + $0x1318] sm:$0xff]  ;;  %v1699_v10 = vld [vmem:[#allocation6 + $0x1300] sm:$0xff] }
 0x488   :  { %1743 = vmatpush.msra.mxu0 %v1687_v18  ;;  %1783 = vmatpush.msra.mxu2 %v1688_v41  ;;  %v1835_v18 = vld [vmem:[%s2387_s5 + $0x68] sm:$0xff]  ;;  %v1852_v41 = vld [vmem:[%s2387_s5 + $0xf0] sm:$0xff] }
 0x489   :  { %1761 = vmatpush.msra.mxu1 %v1723_v14  ;;  %1801 = vmatpush.msra.mxu3 %v1724_v17  ;;  %v1836_v14 = vld [vmem:[%s2387_s5 + $0x70] sm:$0xff]  ;;  %v1853_v17 = vld [vmem:[%s2387_s5 + $0xf8] sm:$0xff] }
 0x48a   :  { %1744 = vmatpush.msra.mxu0 %v1685_v20  ;;  %1784 = vmatpush.msra.mxu2 %v1686_v21  ;;  %v1850_v20 = vld [vmem:[%s2387_s5 + $0xe0] sm:$0xff]  ;;  %v1833_v21 = vld [vmem:[%s2387_s5 + $0x58] sm:$0xff] }
 0x48b   :  { %1762 = vmatpush.msra.mxu1 %v1721_v53  ;;  %1802 = vmatpush.msra.mxu3 %v1722_v19  ;;  %v1851_v53 = vld [vmem:[%s2387_s5 + $0xe8] sm:$0xff]  ;;  %v1834_v19 = vld [vmem:[%s2387_s5 + $0x60] sm:$0xff] }
 0x48c   :  { %1745 = vmatpush.msra.mxu0 %v1683_v23  ;;  %1785 = vmatpush.msra.mxu2 %v1684_v24  ;;  %v1831_v23 = vld [vmem:[%s2387_s5 + $0x48] sm:$0xff]  ;;  %v1830_v24 = vld [vmem:[%s2387_s5 + $0x40] sm:$0xff] }
 0x48d   :  { %1763 = vmatpush.msra.mxu1 %v1719_v22  ;;  %1803 = vmatpush.msra.mxu3 %v1720_v56  ;;  %v1832_v22 = vld [vmem:[%s2387_s5 + $0x50] sm:$0xff] }
 0x48e   :  { %1746 = vmatpush.msra.mxu0 %v1681_v28  ;;  %1786 = vmatpush.msra.mxu2 %v1682_v29  ;;  %v1848_v56 = vld [vmem:[%s2387_s5 + $0xd0] sm:$0xff] }
 0x48f   :  { %1764 = vmatpush.msra.mxu1 %v1717_v25  ;;  %1804 = vmatpush.msra.mxu3 %v1718_v26  ;;  %v1578_v25 = vld [vmem:[#allocation7 + $0x10] ss:$8 sm:$0x3] }
 0x490   :  { %1747 = vmatpush.msra.mxu0 %v1679_v31  ;;  %1787 = vmatpush.msra.mxu2 %v1680_v32  ;;  %v1829_v26 = vld [vmem:[%s2387_s5 + $0x38] sm:$0xff]  ;;  %v1581_v32 = vperm.slane %v1578_v25, 1 }
 0x491   :  { %1765 = vmatpush.msra.mxu1 %v1715_v48  ;;  %1805 = vmatpush.msra.mxu3 %v1716_v11  ;;  %v1845_v48 = vld [vmem:[%s2387_s5 + $0xb8] sm:$0xff]  ;;  %v1844_v11 = vld [vmem:[%s2387_s5 + $0xb0] sm:$0xff] }
 0x492   :  { %1748 = vmatpush.msra.mxu0 %v1677_v47  ;;  %v1826_v47 = vld [vmem:[%s2387_s5 + $0x20] sm:$0xff] }
 0x493   :  { %1766 = vmatpush.msra.mxu1 %v1713_v50  ;;  %v1843_v50 = vld [vmem:[%s2387_s5 + $0xa8] sm:$0xff] }
 0x494   :  { %1749 = vmatpush.msra.mxu0 %v1675_v49  ;;  %v1824_v49 = vld [vmem:[%s2387_s5 + $0x10] sm:$0xff] }
 0x495   :  { %1767 = vmatpush.msra.mxu1 %v1711_v16  ;;  %v1841_v16 = vld [vmem:[%s2387_s5 + $0x98] sm:$0xff] }
 0x496   :  { %1750 = vmatpush.msra.mxu0 %v1673_v52  ;;  %v1822_v52 = vld [vmem:[%s2387_s5] sm:$0xff] }
 0x497   :  { %1768 = vmatpush.msra.mxu1 %v1709_v58  ;;  %v1906_v58 = vld [vmem:[%s2389_s7 + $0x38] sm:$0xff] }
 0x498   :  { %1751 = vmatpush.msra.mxu0 %v1671_v57  ;;  %v1838_v57 = vld [vmem:[%s2387_s5 + $0x80] sm:$0xff] }
 0x499   :  { %1769 = vmatpush.msra.mxu1 %v1707_v62 }
 0x49a   :  { %1752 = vmatpush.msra.mxu0 %v1669_v61 }
 0x49b   :  { %1770 = vmatpush.msra.mxu1 %v1705_v2 }
 0x49c   :  { %1753 = vmatpush.msra.mxu0 %v1667_v1 }
 0x49d   :  { %1771 = vmatpush.msra.mxu1 %v1703_v5 }
 0x49f   :  { %1772 = vmatpush.msra.mxu1 %v1701_v7 }
 0x4a1   :  { %1773 = vmatpush.msra.mxu1 %v1699_v10 }
 0x4f9   :  { %v1445_v30 = vpop.f32.mrf.mxu0 }
 0x4fa   :  { %v1446_v33 = vadd.f32 %v1445_v30, %v1424_v27  ;;  %v1580_v27 = vperm.slane %v1578_v25, 0 }
 0x4ff   :  { %v1465_v34 = vpop.f32.mrf.mxu1  ;;  %v1485_v37 = vpop.f32.mrf.mxu2 }
 0x500   :  { %v1466_v35 = vadd.f32 %v1465_v34, %v1446_v33  ;;  %v1486_v40 = vadd.f32 %v1485_v37, %v1425_v36 }
 0x502   :  { %v1508_v38 = vadd.f32 %v1466_v35, %v2235_v9  ;;  %v1678_v9 = vld [vmem:[#allocation6 + $0x1258] sm:$0xff] }
 0x503   :  { %1788 = vmatpush.msra.mxu2 %v1678_v9  ;;  %v1825_v9 = vld [vmem:[%s2387_s5 + $0x18] sm:$0xff] }
 0x504   :  { %v2245_v39 = vmax.f32 %v1508_v38, 0.0 }
 0x505   :  { %v1505_v42 = vpop.f32.mrf.mxu3  ;;  %1789 = vmatpush.msra.mxu2 %v1676_v51  ;;  %v1823_v51 = vld [vmem:[%s2387_s5 + $0x8] sm:$0xff] }
 0x506   :  { %v1506_v43 = vadd.f32 %v1505_v42, %v1486_v40  ;;  %1600 = vmatmul.f32.vlgmr.msrb.gmra.mxu0 %v2245_v39  ;;  %1640 = vmatmul.f32.vlgmr.msrb.gmra.mxu2 %v2245_v39  ;;  %v1828_v40 = vld [vmem:[%s2387_s5 + $0x30] sm:$0xff]  ;;  %v1847_v42 = vld [vmem:[%s2387_s5 + $0xc8] sm:$0xff] }
 0x507   :  { %1790 = vmatpush.msra.mxu2 %v1674_v54  ;;  %1858 = vmatpush.msrb.mxu0 %v1837_v13  ;;  %v1840_v54 = vld [vmem:[%s2387_s5 + $0x90] sm:$0xff]  ;;  %v1904_v13 = vld [vmem:[%s2389_s7 + $0x28] sm:$0xff] }
 0x508   :  { %v1509_v44 = vadd.f32 %v1506_v43, %v2240_v15  ;;  %v1714_v15 = vld [vmem:[#allocation6 + $0x1378] sm:$0xff]  ;;  %v1827_v43 = vld [vmem:[%s2387_s5 + $0x28] sm:$0xff] }
 0x509   :  { %1806 = vmatpush.msra.mxu3 %v1714_v15  ;;  %1791 = vmatpush.msra.mxu2 %v1672_v59  ;;  %v1842_v15 = vld [vmem:[%s2387_s5 + $0xa0] sm:$0xff]  ;;  %v1905_v59 = vld [vmem:[%s2389_s7 + $0x30] sm:$0xff] }
 0x50a   :  { %v2250_v45 = vmax.f32 %v1509_v44, 0.0  ;;  %1859 = vmatpush.msrb.mxu0 %v1836_v14  ;;  %v1846_v44 = vld [vmem:[%s2387_s5 + $0xc0] sm:$0xff] }
 0x50b   :  { %1807 = vmatpush.msra.mxu3 %v1712_v55  ;;  %1792 = vmatpush.msra.mxu2 %v1670_v63  ;;  %v1839_v55 = vld [vmem:[%s2387_s5 + $0x88] sm:$0xff]  ;;  %v1903_v14 = vld [vmem:[%s2389_s7 + $0x20] sm:$0xff] }
 0x50c   :  { %1620 = vmatmul.f32.vlgmr.msrb.gmra.mxu1 %v2250_v45  ;;  %1660 = vmatmul.f32.vlgmr.msrb.gmra.mxu3 %v2250_v45 }
 0x50d   :  { %1808 = vmatpush.msra.mxu3 %v1710_v60  ;;  %1793 = vmatpush.msra.mxu2 %v1668_v3  ;;  %v1732_v60 = vld [vmem:[#allocation7 + $0x11] ss:$8 sm:$0x3] }
 0x50e   :  { %1878 = vmatpush.msrb.mxu1 %v1853_v17  ;;  %1860 = vmatpush.msrb.mxu0 %v1835_v18  ;;  %v1734_v61 = vperm.slane %v1732_v60, 0  ;;  %v1735_v2 = vperm.slane %v1732_v60, 1  ;;  %v1900_v17 = vld [vmem:[%s2389_s7 + $0x8] sm:$0xff]  ;;  %v1899_v18 = vld [vmem:[%s2389_s7] sm:$0xff] }
 0x50f   :  { %1809 = vmatpush.msra.mxu3 %v1708_v0  ;;  %1923 = vmatpush.msrb.mxu2 %v1906_v58 }
 0x510   :  { %1879 = vmatpush.msrb.mxu1 %v1852_v41  ;;  %1861 = vmatpush.msrb.mxu0 %v1834_v19  ;;  %v1966_v41 = vld [vmem:[#allocation9] ss:$0 sm:$0xff] }
 0x511   :  { %1810 = vmatpush.msra.mxu3 %v1706_v4  ;;  %1924 = vmatpush.msrb.mxu2 %v1905_v59 }
 0x512   :  { %1880 = vmatpush.msrb.mxu1 %v1851_v53  ;;  %1862 = vmatpush.msrb.mxu0 %v1833_v21 }
 0x513   :  { %1811 = vmatpush.msra.mxu3 %v1704_v6  ;;  %1925 = vmatpush.msrb.mxu2 %v1904_v13 }
 0x514   :  { %1881 = vmatpush.msrb.mxu1 %v1850_v20  ;;  %1863 = vmatpush.msrb.mxu0 %v1832_v22  ;;  %v1967_v22 = vld [vmem:[#allocation10] ss:$0 sm:$0xff] }
 0x515   :  { %1812 = vmatpush.msra.mxu3 %v1702_v8  ;;  %1926 = vmatpush.msrb.mxu2 %v1903_v14 }
 0x516   :  { %1882 = vmatpush.msrb.mxu1 %v1849_v46  ;;  %1864 = vmatpush.msrb.mxu0 %v1831_v23 }
 0x517   :  { %1813 = vmatpush.msra.mxu3 %v1700_v12 }
 0x518   :  { %1883 = vmatpush.msrb.mxu1 %v1848_v56  ;;  %1865 = vmatpush.msrb.mxu0 %v1830_v24 }
 0x51a   :  { %1866 = vmatpush.msrb.mxu0 %v1829_v26  ;;  %1884 = vmatpush.msrb.mxu1 %v1847_v42 }
 0x51c   :  { %1867 = vmatpush.msrb.mxu0 %v1828_v40  ;;  %1885 = vmatpush.msrb.mxu1 %v1846_v44 }
 0x51e   :  { %1868 = vmatpush.msrb.mxu0 %v1827_v43  ;;  %1886 = vmatpush.msrb.mxu1 %v1845_v48 }
 0x520   :  { %1869 = vmatpush.msrb.mxu0 %v1826_v47  ;;  %1887 = vmatpush.msrb.mxu1 %v1844_v11 }
 0x522   :  { %1870 = vmatpush.msrb.mxu0 %v1825_v9  ;;  %1888 = vmatpush.msrb.mxu1 %v1843_v50 }
 0x524   :  { %1871 = vmatpush.msrb.mxu0 %v1824_v49  ;;  %1889 = vmatpush.msrb.mxu1 %v1842_v15 }
 0x526   :  { %1872 = vmatpush.msrb.mxu0 %v1823_v51  ;;  %1890 = vmatpush.msrb.mxu1 %v1841_v16 }
 0x528   :  { %1873 = vmatpush.msrb.mxu0 %v1822_v52  ;;  %1891 = vmatpush.msrb.mxu1 %v1840_v54 }
 0x52a   :  { %1892 = vmatpush.msrb.mxu1 %v1839_v55 }
 0x52c   :  { %1893 = vmatpush.msrb.mxu1 %v1838_v57 }
 0x583   :  { %v1601_v28 = vpop.f32.mrf.mxu0 }
 0x584   :  { %v1602_v29 = vadd.f32 %v1601_v28, %v1580_v27 }
 0x589   :  { %v1621_v30 = vpop.f32.mrf.mxu1  ;;  %v1641_v33 = vpop.f32.mrf.mxu2 }
 0x58a   :  { %v1622_v31 = vadd.f32 %v1621_v30, %v1602_v29  ;;  %v1642_v35 = vadd.f32 %v1641_v33, %v1581_v32 }
 0x58c   :  { %v1664_v34 = vmax.f32 %v1622_v31, 0.0 }
 0x58e   :  { %1754 = vmatmul.f32.vlgmr.msra.gmra.mxu0 %v1664_v34  ;;  %1794 = vmatmul.f32.vlgmr.msra.gmra.mxu2 %v1664_v34 }
 0x58f   :  { %v1661_v36 = vpop.f32.mrf.mxu3 }
 0x590   :  { %v1662_v37 = vadd.f32 %v1661_v36, %v1642_v35 }
 0x592   :  { %v1665_v38 = vmax.f32 %v1662_v37, 0.0 }
 0x594   :  { %1774 = vmatmul.f32.vlgmr.msra.gmra.mxu1 %v1665_v38  ;;  %1814 = vmatmul.f32.vlgmr.msra.gmra.mxu3 %v1665_v38 }
 0x60b   :  { %v1755_v62 = vpop.f32.mrf.mxu0 }
 0x60c   :  { %v1756_v63 = vadd.f32 %v1755_v62, %v1734_v61 }
 0x611   :  { %v1775_v0 = vpop.f32.mrf.mxu1  ;;  %v1795_v3 = vpop.f32.mrf.mxu2 }
 0x612   :  { %v1776_v1 = vadd.f32 %v1775_v0, %v1756_v63  ;;  %v1796_v6 = vadd.f32 %v1795_v3, %v1735_v2 }
 0x614   :  { %v1818_v4 = vadd.f32 %v1776_v1, %v2245_v39  ;;  %v1902_v39 = vld [vmem:[%s2389_s7 + $0x18] sm:$0xff] }
 0x615   :  { %1927 = vmatpush.msrb.mxu2 %v1902_v39 }
 0x616   :  { %v1820_v5 = vmax.f32 %v1818_v4, 0.0 }
 0x617   :  { %v1815_v7 = vpop.f32.mrf.mxu3 }
 0x618   :  { %v1816_v8 = vadd.f32 %v1815_v7, %v1796_v6  ;;  %1874 = vmatmul.f32.vlgmr.msrb.gmra.mxu0 %v1820_v5 }
 0x61a   :  { %v1819_v10 = vadd.f32 %v1816_v8, %v2250_v45  ;;  %v1901_v45 = vld [vmem:[%s2389_s7 + $0x10] sm:$0xff] }
 0x61b   :  { %1928 = vmatpush.msrb.mxu2 %v1901_v45 }
 0x61c   :  { %v1821_v12 = vmax.f32 %v1819_v10, 0.0 }
 0x61d   :  { %1929 = vmatpush.msrb.mxu2 %v1900_v17 }
 0x61e   :  { %1894 = vmatmul.f32.vlgmr.msrb.gmra.mxu1 %v1821_v12 }
 0x61f   :  { %1930 = vmatpush.msrb.mxu2 %v1899_v18 }
 0x695   :  { %v1875_v53 = vpop.f32.mrf.mxu0 }
 0x696   :  { %v1876_v19 = vadd.f32 %v1966_v41, %v1875_v53 }
 0x69b   :  { %v1895_v20 = vpop.f32.mrf.mxu1 }
 0x69c   :  { %v1896_v21 = vadd.f32 %v1895_v20, %v1876_v19 }
 0x69e   :  { %v1898_v46 = vmax.f32 %v1896_v21, 0.0 }
 0x6a0   :  { %1957 = vmatmul.msk.f32.vlgmr.msrb.gmra.mxu2 %vm1911_vm0, %v1898_v46 }
 0x723   :  { %v1932_v56 = vpop.f32.mrf.mxu2 }
 0x724   :  { %v1933_v23 = vadd.f32 %v1967_v22, %v1932_v56 }
 0x726   :  { %v1936_v24 = vsel %vm1935_vm1, %v1933_v23, -inf }
 0x727   :  { %1937 = vmax.xlane.f32.xlu0 %v1936_v24 }
 0x79a   :  { %v1938_v25 = vpop.xlane.xlu0 %1937 }
 0x79b   :  { %v1939_v26 = vsub.f32 %v1933_v23, %v1938_v25 }
 0x79d   :  { %v1940_v27 = vmul.f32 1.442695, %v1939_v26 }
 0x79f   :  { %1968 = vpow2.f32 %v1940_v27 }
 0x7a5   :  { %v1969_v28 = vpop.eup %1968 }
 0x7a6   :  { %v1942_v29 = vsel %vm1935_vm1, %v1969_v28, 0.0 }
 0x7a7   :  { %1943 = vadd.xlane.f32.xlu0 %v1942_v29 }
 0x81a   :  { %v1944_v30 = vpop.xlane.xlu0 %1943 }
 0x81b   :  { %1970 = vlog2.f32 %v1944_v30 }
 0x821   :  { %v1971_v31 = vpop.eup %1970 }
 0x822   :  { %v1946_v32 = vmul.f32 0.6931472, %v1971_v31 }
 0x824   :  { %v1947_v33 = vsub.f32 %v1939_v26, %v1946_v32 }
 0x826   :  { %1948 = vst.msk [vmem:[%s2391_s9] sm:$0xff] %vm1935_vm1, %v1947_v33 }
 0x827   :  { %1953 = vsyncpa [#allocation3], 1 }
 0x828   :  { %1954 = vsyncpa [#allocation5], 1 }
 0x829   :  { %1955 = vsyncpa [#allocation8], 1 }
 0x82a   :  { %1956 = vsyncpa [#allocation11], 1 }

</bundles_post_ra>
